<compile_context>
chip_gen: v6e
topology: v6e:2x2x1
jax: 0.10.0
libtpu: 0.0.40
codegen_flags: <defaults>
</compile_context>

<pallas_src>
import functools

import jax
import jax.numpy as jnp
from jax import lax
from jax.experimental import pallas as pl
from jax.experimental.pallas import tpu as pltpu

NEG_INF = float("-inf")


def _sigmoid(t):
    # 0.5*(tanh(t/2)+1): single EUP transcendental, no VPU divide.
    return 0.5 * (jnp.tanh(0.5 * t) + 1.0)


def _silu(t):
    return t * _sigmoid(t)


def sppf_attention_kernel(x_ref, w1_ref, b1_ref, wall_ref, ball_ref, bv2_ref,
                          o_ref, *, H, W, HW):
    c_ = w1_ref.shape[0]                  # hidden = C1 // 2
    c2 = o_ref.shape[1]                   # output channels
    HWp = x_ref.shape[2]                  # lane-padded H*W

    x = x_ref[0]                          # (C1, HWp) bf16

    # ---- cv1: 1x1 conv (+ folded BN) + SiLU; bf16 MXU in, f32 accumulate ----
    x1 = _silu(jnp.dot(w1_ref[...], x, preferred_element_type=jnp.float32)
               + b1_ref[...])             # (c_, HWp) f32

    # ---- hoisted additive pool masks (broadcast once, shared by 3 pools) ----
    pos = lax.broadcasted_iota(jnp.int32, (1, HWp), 1)
    wq = pos % W
    lane_valid = pos < HW
    shifts = (-2, -1, 1, 2)

    def addmask(cond):
        return jnp.broadcast_to(
            jnp.where(cond, 0.0, NEG_INF).astype(jnp.float32), (c_, HWp))

    w_shift = [(-d) % HWp for d in shifts]
    w_mask = [addmask(jnp.logical_and(wq + d >= 0, wq + d <= W - 1))
              for d in shifts]
    h_shift = [(-d * W) % HWp for d in shifts]
    h_mask = [addmask(jnp.logical_and(pos + d * W >= 0, pos + d * W <= HW - 1))
              for d in shifts]

    def pool5(t):
        """nn.MaxPool2d(k=5,s=1,p=2) on flat (c_, HWp): separable 5x1 / 1x5,
        shifts via XLU roll, out-of-range neighbours pushed to -inf by an
        additive mask (no per-shift select)."""
        r = t
        for s, m in zip(w_shift, w_mask):
            r = jnp.maximum(r, pltpu.roll(t, s, 1) + m)
        out = r
        for s, m in zip(h_shift, h_mask):
            out = jnp.maximum(out, pltpu.roll(r, s, 1) + m)
        return out

    y1 = pool5(x1)
    y2 = pool5(y1)
    y3 = pool5(y2)

    # ---- all remaining 1x1 convs in ONE stacked matmul, accumulated per -----
    # ---- concat piece (no cat materialization).  Rows: [v2; w2; a; k]. ------
    pre = jnp.dot(wall_ref[0], x1.astype(jnp.bfloat16),
                  preferred_element_type=jnp.float32)
    pre = pre + jnp.dot(wall_ref[1], y1.astype(jnp.bfloat16),
                        preferred_element_type=jnp.float32)
    pre = pre + jnp.dot(wall_ref[2], y2.astype(jnp.bfloat16),
                        preferred_element_type=jnp.float32)
    pre = pre + jnp.dot(wall_ref[3], y3.astype(jnp.bfloat16),
                        preferred_element_type=jnp.float32)
    pre = pre + ball_ref[...]

    v2 = pre[0:c2, :]                            # (c2, HWp) = (w2@wm@wv)@cat
    w2cat = pre[c2:2 * c2, :]                    # (c2, HWp) = w2@cat + b2
    a = _sigmoid(pre[2 * c2:2 * c2 + 1, :])      # (1, HWp)
    k_pre = pre[2 * c2 + 1:2 * c2 + 2, :]        # (1, HWp)

    # ---- softmax over the valid spatial positions (EUP exp + approx recip) --
    k_pre = jnp.where(lane_valid, k_pre, NEG_INF)
    k_exp = jnp.exp(k_pre - jnp.max(k_pre, axis=-1, keepdims=True))
    k_sm = k_exp * pl.reciprocal(jnp.sum(k_exp, axis=-1, keepdims=True),
                                 approx=True)

    # ---- ym2 = (w2@wm)(v@softmax(k)) + w2@(wm@bv + bm); bias added after the
    # ---- reduce so it is exact even with the approximate reciprocal. --------
    ym2 = jnp.sum(v2 * k_sm, axis=-1, keepdims=True) + bv2_ref[...]   # (c2, 1)

    # ---- cv2(cat + m(y)*a) = (w2@cat + b2) + ym2 * a, then SiLU -------------
    o_ref[0] = _silu(w2cat + ym2 * a).astype(o_ref.dtype)


def _run_pallas(ins, *, N, C1, c2, HWp, H, W, HW, vmem_limit, single_buffer):
    # Grid-invariant operands: single-buffer to halve their VMEM footprint.
    opt = dict(pipeline_mode=pl.Buffered(1)) if single_buffer else {}

    def const_spec(a):
        return pl.BlockSpec(a.shape, lambda n, _nd=a.ndim: (0,) * _nd, **opt)

    in_specs = [pl.BlockSpec((1, C1, HWp), lambda n: (n, 0, 0))]
    in_specs += [const_spec(a) for a in ins[1:]]

    return pl.pallas_call(
        functools.partial(sppf_attention_kernel, H=H, W=W, HW=HW),
        out_shape=jax.ShapeDtypeStruct((N, c2, HWp), jnp.float32),
        grid_spec=pltpu.PrefetchScalarGridSpec(
            num_scalar_prefetch=0,
            grid=(N,),
            in_specs=in_specs,
            out_specs=pl.BlockSpec((1, c2, HWp), lambda n: (n, 0, 0)),
        ),
        compiler_params=pltpu.CompilerParams(
            dimension_semantics=("parallel",),
            vmem_limit_bytes=vmem_limit,
        ),
    )(*ins)


def sppf_attention_forward(x, params):
    N, C1, H, W = x.shape
    c_ = params["w1"].shape[0]
    c2 = params["w2"].shape[0]
    HW = H * W
    HWp = ((HW + 127) // 128) * 128       # lane-dense loads/stores

    xf = x.reshape(N, C1, HW)
    if HWp != HW:
        xf = jnp.pad(xf, ((0, 0), (0, 0), (0, HWp - HW)))
    xf = xf.astype(jnp.bfloat16)          # halves HBM DMA bytes; MXU is bf16

    def col(v):
        return jnp.asarray(v, jnp.float32).reshape(-1, 1)

    # Fold m into cv2 (rank-1 identity) and then through v (softmax sums to 1):
    #   cv2(cat + m(v@k)*a) = w2@cat + b2 + ((w2@wm@wv)@cat@k + w2@(wm@bv+bm))*a
    wm2 = jnp.dot(params["w2"], params["wm"])            # (c2, ci)
    wv2 = jnp.dot(wm2, params["wv"])                     # (c2, 4*c_)
    bv2 = col(jnp.dot(wm2, params["bv"]) + jnp.dot(params["w2"], params["bm"]))

    # Stacked 1x1-conv weights; wall[j] multiplies concat piece j (x1,y1,y2,y3).
    # Output row order: [v2 (c2); cv2 (c2); a (1); k (1)].
    w_stack = jnp.concatenate(
        [wv2, params["w2"], params["wa"], params["wk"]], axis=0)   # (M, 4*c_)
    M = w_stack.shape[0]
    wall = jnp.transpose(w_stack.reshape(M, 4, c_), (1, 0, 2)).astype(jnp.bfloat16)
    ball = col(jnp.concatenate([jnp.zeros((c2,), jnp.float32),
                                params["b2"], params["ba"], params["bk"]]))

    ins = (xf, params["w1"].astype(jnp.bfloat16), col(params["b1"]), wall, ball, bv2)

    # VMEM budget derived from actual shapes (v7x has only 64 MiB physical).
    bytes_x = C1 * HWp * 2
    bytes_o = c2 * HWp * 4
    bytes_w = sum(int(a.size) * jnp.dtype(a.dtype).itemsize for a in ins[1:])
    bytes_tmp = (12 * c_ + M + 8) * HWp * 4   # x1..y3, pool masks, pre, rows
    need = 2 * (bytes_x + bytes_o) + 2 * bytes_w + 2 * bytes_tmp
    try:
        cap = int(pltpu.get_tpu_info().vmem_capacity_bytes)
    except Exception:
        cap = 64 * 1024 * 1024
    vmem_limit = int(min(max(need, 16 * 1024 * 1024), (cap * 7) // 8))

    kw = dict(N=N, C1=C1, c2=c2, HWp=HWp, H=H, W=W, HW=HW, vmem_limit=vmem_limit)
    try:
        out = _run_pallas(ins, single_buffer=True, **kw)
    except Exception:
        # pl.Buffered / pipeline_mode unavailable on this jax version:
        # fall back to default double-buffering of the constant operands.
        out = _run_pallas(ins, single_buffer=False, **kw)

    return out[:, :, :HW].reshape(N, c2, H, W)


# ------------------------- deterministic parameters -------------------------
def make_params(key, c1, c2):
    c_ = c1 // 2
    cc = c_ * 4
    ci = cc  # reduction = 1
    keys = jax.random.split(key, 12)
    eps = 1e-3

    def fused_conv_bn(kw, kb, cout, cin):
        w = jax.random.normal(kw, (cout, cin), jnp.float32) * 0.3
        gamma = 1.0 + 0.1 * jax.random.normal(kb, (cout,), jnp.float32)
        beta = 0.1 * jax.random.normal(jax.random.fold_in(kb, 1), (cout,), jnp.float32)
        mean = 0.1 * jax.random.normal(jax.random.fold_in(kb, 2), (cout,), jnp.float32)
        var = jnp.abs(jax.random.normal(jax.random.fold_in(kb, 3), (cout,), jnp.float32)) + 1.0
        scale = gamma / jnp.sqrt(var + eps)
        return w * scale[:, None], beta - mean * scale

    def conv_bias(kw, kb, cout, cin):
        w = jax.random.normal(kw, (cout, cin), jnp.float32) * 0.25
        b = 0.1 * jax.random.normal(kb, (cout,), jnp.float32)
        return w, b

    w1, b1 = fused_conv_bn(keys[0], keys[1], c_, c1)
    w2, b2 = fused_conv_bn(keys[2], keys[3], c2, cc)
    wa, ba = conv_bias(keys[4], keys[5], 1, cc)
    wk, bk = conv_bias(keys[6], keys[7], 1, cc)
    wv, bv = conv_bias(keys[8], keys[9], ci, cc)
    wm, bm = conv_bias(keys[10], keys[11], cc, ci)
    return dict(w1=w1, b1=b1, w2=w2, b2=b2, wa=wa, ba=ba, wk=wk, bk=bk,
                wv=wv, bv=bv, wm=wm, bm=bm)


# --------------------------- pure-JAX reference ------------------------------
def reference_forward(x, params):
    def conv1x1(t, w, b):
        y = jnp.einsum("oc,nchw->nohw", w, t, precision=lax.Precision.HIGHEST)
        return y + b[None, :, None, None]

    def silu(t):
        return t * jax.nn.sigmoid(t)

    def maxpool5(t):
        return lax.reduce_window(t, -jnp.inf, lax.max,
                                 (1, 1, 5, 5), (1, 1, 1, 1),
                                 ((0, 0), (0, 0), (2, 2), (2, 2)))

    x1 = silu(conv1x1(x, params["w1"], params["b1"]))
    y1 = maxpool5(x1)
    y2 = maxpool5(y1)
    y3 = maxpool5(y2)
    cat = jnp.concatenate([x1, y1, y2, y3], axis=1)
    n, _, H, W = cat.shape
    ci = params["wv"].shape[0]
    a = jax.nn.sigmoid(conv1x1(cat, params["wa"], params["ba"]))
    k = conv1x1(cat, params["wk"], params["bk"]).reshape(n, 1, H * W, 1)
    k = jax.nn.softmax(k, axis=2)
    v = conv1x1(cat, params["wv"], params["bv"]).reshape(n, 1, ci, H * W)
    y = jnp.matmul(v, k).reshape(n, ci, 1, 1)
    ym = conv1x1(y, params["wm"], params["bm"])
    att = cat + ym * a
    return silu(conv1x1(att, params["w2"], params["b2"]))


if __name__ == "__main__":
    key = jax.random.PRNGKey(0)
    kx, kp = jax.random.split(key)
    N, C1, C2, H, W = 2, 4, 8, 16, 16
    x = jax.random.normal(kx, (N, C1, H, W), jnp.float32)
    params = make_params(kp, C1, C2)

    out = jax.block_until_ready(sppf_attention_forward(x, params))
    ref = jax.block_until_ready(reference_forward(x, params))

    assert out.shape == (N, C2, H, W), out.shape
    max_err = float(jnp.max(jnp.abs(out - ref)))
    # bf16 MXU operands (f32 accumulation) widen the tolerance vs the f32 ref.
    assert max_err < 4e-2, f"max abs error {max_err}"
    print("KERNEL_OK")
</pallas_src>

<mosaic_0001>
module attributes {stable_mosaic.version = 11 : i64} {
  func.func @sppf_attention_kernel(%arg0: i32, %arg1: memref<1x4x256xbf16, #tpu.memory_space<vmem>>, %arg2: memref<2x4xbf16, #tpu.memory_space<vmem>>, %arg3: memref<2x1xf32, #tpu.memory_space<vmem>>, %arg4: memref<4x18x2xbf16, #tpu.memory_space<vmem>>, %arg5: memref<18x1xf32, #tpu.memory_space<vmem>>, %arg6: memref<8x1xf32, #tpu.memory_space<vmem>>, %arg7: memref<1x8x256xf32, #tpu.memory_space<vmem>>) attributes {dimension_semantics = [#tpu.dimension_semantics<parallel>], iteration_bounds = array<i64: 2>, scalar_prefetch = 0 : i64, scratch_operands = 0 : i64, tpu.core_type = #tpu.core_type<tc>, window_params = [{transform_indices = @transform_0, window_bounds = array<i64: 1, 4, 256>}, {pipeline_mode = #tpu.pipeline_mode<synchronous>, transform_indices = @transform_1, window_bounds = array<i64: 2, 4>}, {pipeline_mode = #tpu.pipeline_mode<synchronous>, transform_indices = @transform_2, window_bounds = array<i64: 2, 1>}, {pipeline_mode = #tpu.pipeline_mode<synchronous>, transform_indices = @transform_3, window_bounds = array<i64: 4, 18, 2>}, {pipeline_mode = #tpu.pipeline_mode<synchronous>, transform_indices = @transform_4, window_bounds = array<i64: 18, 1>}, {pipeline_mode = #tpu.pipeline_mode<synchronous>, transform_indices = @transform_5, window_bounds = array<i64: 8, 1>}, {transform_indices = @transform_6, window_bounds = array<i64: 1, 8, 256>}]} {
    %c0 = arith.constant 0 : index
    %c0_0 = arith.constant 0 : index
    %c0_1 = arith.constant 0 : index
    %0 = vector.load %arg1[%c0, %c0_0, %c0_1] : memref<1x4x256xbf16, #tpu.memory_space<vmem>>, vector<1x4x256xbf16>
    %1 = vector.shape_cast %0 : vector<1x4x256xbf16> to vector<4x256xbf16>
    %c0_2 = arith.constant 0 : index
    %c0_3 = arith.constant 0 : index
    %2 = vector.load %arg2[%c0_2, %c0_3] : memref<2x4xbf16, #tpu.memory_space<vmem>>, vector<2x4xbf16>
    %cst = arith.constant dense<0.000000e+00> : vector<2x256xf32>
    %3 = tpu.matmul %2, %1, %cst {dimension_numbers = #tpu.dot_dimension_numbers<[1], [0], [0], [1], [0, 0, 1, 1], [], []>} : vector<2x4xbf16>, vector<4x256xbf16>, vector<2x256xf32> -> vector<2x256xf32>
    %c0_4 = arith.constant 0 : index
    %c0_5 = arith.constant 0 : index
    %4 = vector.load %arg3[%c0_4, %c0_5] : memref<2x1xf32, #tpu.memory_space<vmem>>, vector<2x1xf32>
    %5 = vector.broadcast %4 : vector<2x1xf32> to vector<2x256xf32>
    %6 = arith.addf %3, %5 : vector<2x256xf32>
    %cst_6 = arith.constant 5.000000e-01 : f32
    %7 = vector.broadcast %cst_6 : f32 to vector<2x256xf32>
    %8 = arith.mulf %7, %6 : vector<2x256xf32>
    %9 = math.tanh %8 : vector<2x256xf32>
    %cst_7 = arith.constant 1.000000e+00 : f32
    %10 = vector.broadcast %cst_7 : f32 to vector<2x256xf32>
    %11 = arith.addf %9, %10 : vector<2x256xf32>
    %cst_8 = arith.constant 5.000000e-01 : f32
    %12 = vector.broadcast %cst_8 : f32 to vector<2x256xf32>
    %13 = arith.mulf %12, %11 : vector<2x256xf32>
    %14 = arith.mulf %6, %13 : vector<2x256xf32>
    %15 = tpu.iota {dimensions = array<i32: 1>} : vector<1x256xi32>
    %c16_i32 = arith.constant 16 : i32
    %c0_i32 = arith.constant 0 : i32
    %16 = arith.cmpi eq, %c16_i32, %c0_i32 : i32
    %c1_i32 = arith.constant 1 : i32
    %17 = arith.select %16, %c1_i32, %c16_i32 : i32
    %18 = vector.broadcast %17 : i32 to vector<1x256xi32>
    %19 = arith.remsi %15, %18 : vector<1x256xi32>
    %c0_i32_9 = arith.constant 0 : i32
    %20 = vector.broadcast %c0_i32_9 : i32 to vector<1x256xi32>
    %21 = arith.cmpi ne, %19, %20 : vector<1x256xi32>
    %c0_i32_10 = arith.constant 0 : i32
    %22 = vector.broadcast %c0_i32_10 : i32 to vector<1x256xi32>
    %23 = arith.cmpi slt, %19, %22 : vector<1x256xi32>
    %c0_i32_11 = arith.constant 0 : i32
    %24 = arith.cmpi slt, %17, %c0_i32_11 : i32
    %25 = vector.broadcast %24 : i1 to vector<1x256xi1>
    %26 = vector.broadcast %25 : vector<1x256xi1> to vector<1x256xi1>
    %27 = arith.xori %23, %26 : vector<1x256xi1>
    %28 = arith.andi %27, %21 : vector<1x256xi1>
    %29 = vector.broadcast %17 : i32 to vector<1x256xi32>
    %30 = arith.addi %19, %29 : vector<1x256xi32>
    %31 = arith.select %28, %30, %19 : vector<1x256xi1>, vector<1x256xi32>
    %c256_i32 = arith.constant 256 : i32
    %32 = vector.broadcast %c256_i32 : i32 to vector<1x256xi32>
    %33 = arith.cmpi slt, %15, %32 : vector<1x256xi32>
    %c-2_i32 = arith.constant -2 : i32
    %34 = vector.broadcast %c-2_i32 : i32 to vector<1x256xi32>
    %35 = arith.addi %31, %34 : vector<1x256xi32>
    %c0_i32_12 = arith.constant 0 : i32
    %36 = vector.broadcast %c0_i32_12 : i32 to vector<1x256xi32>
    %37 = arith.cmpi sge, %35, %36 : vector<1x256xi32>
    %c-2_i32_13 = arith.constant -2 : i32
    %38 = vector.broadcast %c-2_i32_13 : i32 to vector<1x256xi32>
    %39 = arith.addi %31, %38 : vector<1x256xi32>
    %c15_i32 = arith.constant 15 : i32
    %40 = vector.broadcast %c15_i32 : i32 to vector<1x256xi32>
    %41 = arith.cmpi sle, %39, %40 : vector<1x256xi32>
    %42 = arith.andi %37, %41 : vector<1x256xi1>
    %cst_14 = arith.constant 0.000000e+00 : f32
    %cst_15 = arith.constant 0xFF800000 : f32
    %43 = vector.broadcast %cst_14 : f32 to vector<1x256xf32>
    %44 = vector.broadcast %cst_15 : f32 to vector<1x256xf32>
    %45 = arith.select %42, %43, %44 : vector<1x256xi1>, vector<1x256xf32>
    %46 = vector.shape_cast %45 : vector<1x256xf32> to vector<1x256xf32>
    %47 = vector.broadcast %46 : vector<1x256xf32> to vector<2x256xf32>
    %c-1_i32 = arith.constant -1 : i32
    %48 = vector.broadcast %c-1_i32 : i32 to vector<1x256xi32>
    %49 = arith.addi %31, %48 : vector<1x256xi32>
    %c0_i32_16 = arith.constant 0 : i32
    %50 = vector.broadcast %c0_i32_16 : i32 to vector<1x256xi32>
    %51 = arith.cmpi sge, %49, %50 : vector<1x256xi32>
    %c-1_i32_17 = arith.constant -1 : i32
    %52 = vector.broadcast %c-1_i32_17 : i32 to vector<1x256xi32>
    %53 = arith.addi %31, %52 : vector<1x256xi32>
    %c15_i32_18 = arith.constant 15 : i32
    %54 = vector.broadcast %c15_i32_18 : i32 to vector<1x256xi32>
    %55 = arith.cmpi sle, %53, %54 : vector<1x256xi32>
    %56 = arith.andi %51, %55 : vector<1x256xi1>
    %cst_19 = arith.constant 0.000000e+00 : f32
    %cst_20 = arith.constant 0xFF800000 : f32
    %57 = vector.broadcast %cst_19 : f32 to vector<1x256xf32>
    %58 = vector.broadcast %cst_20 : f32 to vector<1x256xf32>
    %59 = arith.select %56, %57, %58 : vector<1x256xi1>, vector<1x256xf32>
    %60 = vector.shape_cast %59 : vector<1x256xf32> to vector<1x256xf32>
    %61 = vector.broadcast %60 : vector<1x256xf32> to vector<2x256xf32>
    %c1_i32_21 = arith.constant 1 : i32
    %62 = vector.broadcast %c1_i32_21 : i32 to vector<1x256xi32>
    %63 = arith.addi %31, %62 : vector<1x256xi32>
    %c0_i32_22 = arith.constant 0 : i32
    %64 = vector.broadcast %c0_i32_22 : i32 to vector<1x256xi32>
    %65 = arith.cmpi sge, %63, %64 : vector<1x256xi32>
    %c1_i32_23 = arith.constant 1 : i32
    %66 = vector.broadcast %c1_i32_23 : i32 to vector<1x256xi32>
    %67 = arith.addi %31, %66 : vector<1x256xi32>
    %c15_i32_24 = arith.constant 15 : i32
    %68 = vector.broadcast %c15_i32_24 : i32 to vector<1x256xi32>
    %69 = arith.cmpi sle, %67, %68 : vector<1x256xi32>
    %70 = arith.andi %65, %69 : vector<1x256xi1>
    %cst_25 = arith.constant 0.000000e+00 : f32
    %cst_26 = arith.constant 0xFF800000 : f32
    %71 = vector.broadcast %cst_25 : f32 to vector<1x256xf32>
    %72 = vector.broadcast %cst_26 : f32 to vector<1x256xf32>
    %73 = arith.select %70, %71, %72 : vector<1x256xi1>, vector<1x256xf32>
    %74 = vector.shape_cast %73 : vector<1x256xf32> to vector<1x256xf32>
    %75 = vector.broadcast %74 : vector<1x256xf32> to vector<2x256xf32>
    %c2_i32 = arith.constant 2 : i32
    %76 = vector.broadcast %c2_i32 : i32 to vector<1x256xi32>
    %77 = arith.addi %31, %76 : vector<1x256xi32>
    %c0_i32_27 = arith.constant 0 : i32
    %78 = vector.broadcast %c0_i32_27 : i32 to vector<1x256xi32>
    %79 = arith.cmpi sge, %77, %78 : vector<1x256xi32>
    %c2_i32_28 = arith.constant 2 : i32
    %80 = vector.broadcast %c2_i32_28 : i32 to vector<1x256xi32>
    %81 = arith.addi %31, %80 : vector<1x256xi32>
    %c15_i32_29 = arith.constant 15 : i32
    %82 = vector.broadcast %c15_i32_29 : i32 to vector<1x256xi32>
    %83 = arith.cmpi sle, %81, %82 : vector<1x256xi32>
    %84 = arith.andi %79, %83 : vector<1x256xi1>
    %cst_30 = arith.constant 0.000000e+00 : f32
    %cst_31 = arith.constant 0xFF800000 : f32
    %85 = vector.broadcast %cst_30 : f32 to vector<1x256xf32>
    %86 = vector.broadcast %cst_31 : f32 to vector<1x256xf32>
    %87 = arith.select %84, %85, %86 : vector<1x256xi1>, vector<1x256xf32>
    %88 = vector.shape_cast %87 : vector<1x256xf32> to vector<1x256xf32>
    %89 = vector.broadcast %88 : vector<1x256xf32> to vector<2x256xf32>
    %c-32_i32 = arith.constant -32 : i32
    %90 = vector.broadcast %c-32_i32 : i32 to vector<1x256xi32>
    %91 = arith.addi %15, %90 : vector<1x256xi32>
    %c0_i32_32 = arith.constant 0 : i32
    %92 = vector.broadcast %c0_i32_32 : i32 to vector<1x256xi32>
    %93 = arith.cmpi sge, %91, %92 : vector<1x256xi32>
    %c-32_i32_33 = arith.constant -32 : i32
    %94 = vector.broadcast %c-32_i32_33 : i32 to vector<1x256xi32>
    %95 = arith.addi %15, %94 : vector<1x256xi32>
    %c255_i32 = arith.constant 255 : i32
    %96 = vector.broadcast %c255_i32 : i32 to vector<1x256xi32>
    %97 = arith.cmpi sle, %95, %96 : vector<1x256xi32>
    %98 = arith.andi %93, %97 : vector<1x256xi1>
    %cst_34 = arith.constant 0.000000e+00 : f32
    %cst_35 = arith.constant 0xFF800000 : f32
    %99 = vector.broadcast %cst_34 : f32 to vector<1x256xf32>
    %100 = vector.broadcast %cst_35 : f32 to vector<1x256xf32>
    %101 = arith.select %98, %99, %100 : vector<1x256xi1>, vector<1x256xf32>
    %102 = vector.shape_cast %101 : vector<1x256xf32> to vector<1x256xf32>
    %103 = vector.broadcast %102 : vector<1x256xf32> to vector<2x256xf32>
    %c-16_i32 = arith.constant -16 : i32
    %104 = vector.broadcast %c-16_i32 : i32 to vector<1x256xi32>
    %105 = arith.addi %15, %104 : vector<1x256xi32>
    %c0_i32_36 = arith.constant 0 : i32
    %106 = vector.broadcast %c0_i32_36 : i32 to vector<1x256xi32>
    %107 = arith.cmpi sge, %105, %106 : vector<1x256xi32>
    %c-16_i32_37 = arith.constant -16 : i32
    %108 = vector.broadcast %c-16_i32_37 : i32 to vector<1x256xi32>
    %109 = arith.addi %15, %108 : vector<1x256xi32>
    %c255_i32_38 = arith.constant 255 : i32
    %110 = vector.broadcast %c255_i32_38 : i32 to vector<1x256xi32>
    %111 = arith.cmpi sle, %109, %110 : vector<1x256xi32>
    %112 = arith.andi %107, %111 : vector<1x256xi1>
    %cst_39 = arith.constant 0.000000e+00 : f32
    %cst_40 = arith.constant 0xFF800000 : f32
    %113 = vector.broadcast %cst_39 : f32 to vector<1x256xf32>
    %114 = vector.broadcast %cst_40 : f32 to vector<1x256xf32>
    %115 = arith.select %112, %113, %114 : vector<1x256xi1>, vector<1x256xf32>
    %116 = vector.shape_cast %115 : vector<1x256xf32> to vector<1x256xf32>
    %117 = vector.broadcast %116 : vector<1x256xf32> to vector<2x256xf32>
    %c16_i32_41 = arith.constant 16 : i32
    %118 = vector.broadcast %c16_i32_41 : i32 to vector<1x256xi32>
    %119 = arith.addi %15, %118 : vector<1x256xi32>
    %c0_i32_42 = arith.constant 0 : i32
    %120 = vector.broadcast %c0_i32_42 : i32 to vector<1x256xi32>
    %121 = arith.cmpi sge, %119, %120 : vector<1x256xi32>
    %c16_i32_43 = arith.constant 16 : i32
    %122 = vector.broadcast %c16_i32_43 : i32 to vector<1x256xi32>
    %123 = arith.addi %15, %122 : vector<1x256xi32>
    %c255_i32_44 = arith.constant 255 : i32
    %124 = vector.broadcast %c255_i32_44 : i32 to vector<1x256xi32>
    %125 = arith.cmpi sle, %123, %124 : vector<1x256xi32>
    %126 = arith.andi %121, %125 : vector<1x256xi1>
    %cst_45 = arith.constant 0.000000e+00 : f32
    %cst_46 = arith.constant 0xFF800000 : f32
    %127 = vector.broadcast %cst_45 : f32 to vector<1x256xf32>
    %128 = vector.broadcast %cst_46 : f32 to vector<1x256xf32>
    %129 = arith.select %126, %127, %128 : vector<1x256xi1>, vector<1x256xf32>
    %130 = vector.shape_cast %129 : vector<1x256xf32> to vector<1x256xf32>
    %131 = vector.broadcast %130 : vector<1x256xf32> to vector<2x256xf32>
    %c32_i32 = arith.constant 32 : i32
    %132 = vector.broadcast %c32_i32 : i32 to vector<1x256xi32>
    %133 = arith.addi %15, %132 : vector<1x256xi32>
    %c0_i32_47 = arith.constant 0 : i32
    %134 = vector.broadcast %c0_i32_47 : i32 to vector<1x256xi32>
    %135 = arith.cmpi sge, %133, %134 : vector<1x256xi32>
    %c32_i32_48 = arith.constant 32 : i32
    %136 = vector.broadcast %c32_i32_48 : i32 to vector<1x256xi32>
    %137 = arith.addi %15, %136 : vector<1x256xi32>
    %c255_i32_49 = arith.constant 255 : i32
    %138 = vector.broadcast %c255_i32_49 : i32 to vector<1x256xi32>
    %139 = arith.cmpi sle, %137, %138 : vector<1x256xi32>
    %140 = arith.andi %135, %139 : vector<1x256xi1>
    %cst_50 = arith.constant 0.000000e+00 : f32
    %cst_51 = arith.constant 0xFF800000 : f32
    %141 = vector.broadcast %cst_50 : f32 to vector<1x256xf32>
    %142 = vector.broadcast %cst_51 : f32 to vector<1x256xf32>
    %143 = arith.select %140, %141, %142 : vector<1x256xi1>, vector<1x256xf32>
    %144 = vector.shape_cast %143 : vector<1x256xf32> to vector<1x256xf32>
    %145 = vector.broadcast %144 : vector<1x256xf32> to vector<2x256xf32>
    %c2_i32_52 = arith.constant 2 : i32
    %146 = tpu.dynamic_rotate %14 by %c2_i32_52 dim 1 : vector<2x256xf32>, i32 -> vector<2x256xf32>
    %147 = arith.addf %146, %47 : vector<2x256xf32>
    %148 = arith.maximumf %14, %147 : vector<2x256xf32>
    %c1_i32_53 = arith.constant 1 : i32
    %149 = tpu.dynamic_rotate %14 by %c1_i32_53 dim 1 : vector<2x256xf32>, i32 -> vector<2x256xf32>
    %150 = arith.addf %149, %61 : vector<2x256xf32>
    %151 = arith.maximumf %148, %150 : vector<2x256xf32>
    %c255_i32_54 = arith.constant 255 : i32
    %152 = tpu.dynamic_rotate %14 by %c255_i32_54 dim 1 : vector<2x256xf32>, i32 -> vector<2x256xf32>
    %153 = arith.addf %152, %75 : vector<2x256xf32>
    %154 = arith.maximumf %151, %153 : vector<2x256xf32>
    %c254_i32 = arith.constant 254 : i32
    %155 = tpu.dynamic_rotate %14 by %c254_i32 dim 1 : vector<2x256xf32>, i32 -> vector<2x256xf32>
    %156 = arith.addf %155, %89 : vector<2x256xf32>
    %157 = arith.maximumf %154, %156 : vector<2x256xf32>
    %c32_i32_55 = arith.constant 32 : i32
    %158 = tpu.dynamic_rotate %157 by %c32_i32_55 dim 1 : vector<2x256xf32>, i32 -> vector<2x256xf32>
    %159 = arith.addf %158, %103 : vector<2x256xf32>
    %160 = arith.maximumf %157, %159 : vector<2x256xf32>
    %c16_i32_56 = arith.constant 16 : i32
    %161 = tpu.dynamic_rotate %157 by %c16_i32_56 dim 1 : vector<2x256xf32>, i32 -> vector<2x256xf32>
    %162 = arith.addf %161, %117 : vector<2x256xf32>
    %163 = arith.maximumf %160, %162 : vector<2x256xf32>
    %c240_i32 = arith.constant 240 : i32
    %164 = tpu.dynamic_rotate %157 by %c240_i32 dim 1 : vector<2x256xf32>, i32 -> vector<2x256xf32>
    %165 = arith.addf %164, %131 : vector<2x256xf32>
    %166 = arith.maximumf %163, %165 : vector<2x256xf32>
    %c224_i32 = arith.constant 224 : i32
    %167 = tpu.dynamic_rotate %157 by %c224_i32 dim 1 : vector<2x256xf32>, i32 -> vector<2x256xf32>
    %168 = arith.addf %167, %145 : vector<2x256xf32>
    %169 = arith.maximumf %166, %168 : vector<2x256xf32>
    %c2_i32_57 = arith.constant 2 : i32
    %170 = tpu.dynamic_rotate %169 by %c2_i32_57 dim 1 : vector<2x256xf32>, i32 -> vector<2x256xf32>
    %171 = arith.addf %170, %47 : vector<2x256xf32>
    %172 = arith.maximumf %169, %171 : vector<2x256xf32>
    %c1_i32_58 = arith.constant 1 : i32
    %173 = tpu.dynamic_rotate %169 by %c1_i32_58 dim 1 : vector<2x256xf32>, i32 -> vector<2x256xf32>
    %174 = arith.addf %173, %61 : vector<2x256xf32>
    %175 = arith.maximumf %172, %174 : vector<2x256xf32>
    %c255_i32_59 = arith.constant 255 : i32
    %176 = tpu.dynamic_rotate %169 by %c255_i32_59 dim 1 : vector<2x256xf32>, i32 -> vector<2x256xf32>
    %177 = arith.addf %176, %75 : vector<2x256xf32>
    %178 = arith.maximumf %175, %177 : vector<2x256xf32>
    %c254_i32_60 = arith.constant 254 : i32
    %179 = tpu.dynamic_rotate %169 by %c254_i32_60 dim 1 : vector<2x256xf32>, i32 -> vector<2x256xf32>
    %180 = arith.addf %179, %89 : vector<2x256xf32>
    %181 = arith.maximumf %178, %180 : vector<2x256xf32>
    %c32_i32_61 = arith.constant 32 : i32
    %182 = tpu.dynamic_rotate %181 by %c32_i32_61 dim 1 : vector<2x256xf32>, i32 -> vector<2x256xf32>
    %183 = arith.addf %182, %103 : vector<2x256xf32>
    %184 = arith.maximumf %181, %183 : vector<2x256xf32>
    %c16_i32_62 = arith.constant 16 : i32
    %185 = tpu.dynamic_rotate %181 by %c16_i32_62 dim 1 : vector<2x256xf32>, i32 -> vector<2x256xf32>
    %186 = arith.addf %185, %117 : vector<2x256xf32>
    %187 = arith.maximumf %184, %186 : vector<2x256xf32>
    %c240_i32_63 = arith.constant 240 : i32
    %188 = tpu.dynamic_rotate %181 by %c240_i32_63 dim 1 : vector<2x256xf32>, i32 -> vector<2x256xf32>
    %189 = arith.addf %188, %131 : vector<2x256xf32>
    %190 = arith.maximumf %187, %189 : vector<2x256xf32>
    %c224_i32_64 = arith.constant 224 : i32
    %191 = tpu.dynamic_rotate %181 by %c224_i32_64 dim 1 : vector<2x256xf32>, i32 -> vector<2x256xf32>
    %192 = arith.addf %191, %145 : vector<2x256xf32>
    %193 = arith.maximumf %190, %192 : vector<2x256xf32>
    %c2_i32_65 = arith.constant 2 : i32
    %194 = tpu.dynamic_rotate %193 by %c2_i32_65 dim 1 : vector<2x256xf32>, i32 -> vector<2x256xf32>
    %195 = arith.addf %194, %47 : vector<2x256xf32>
    %196 = arith.maximumf %193, %195 : vector<2x256xf32>
    %c1_i32_66 = arith.constant 1 : i32
    %197 = tpu.dynamic_rotate %193 by %c1_i32_66 dim 1 : vector<2x256xf32>, i32 -> vector<2x256xf32>
    %198 = arith.addf %197, %61 : vector<2x256xf32>
    %199 = arith.maximumf %196, %198 : vector<2x256xf32>
    %c255_i32_67 = arith.constant 255 : i32
    %200 = tpu.dynamic_rotate %193 by %c255_i32_67 dim 1 : vector<2x256xf32>, i32 -> vector<2x256xf32>
    %201 = arith.addf %200, %75 : vector<2x256xf32>
    %202 = arith.maximumf %199, %201 : vector<2x256xf32>
    %c254_i32_68 = arith.constant 254 : i32
    %203 = tpu.dynamic_rotate %193 by %c254_i32_68 dim 1 : vector<2x256xf32>, i32 -> vector<2x256xf32>
    %204 = arith.addf %203, %89 : vector<2x256xf32>
    %205 = arith.maximumf %202, %204 : vector<2x256xf32>
    %c32_i32_69 = arith.constant 32 : i32
    %206 = tpu.dynamic_rotate %205 by %c32_i32_69 dim 1 : vector<2x256xf32>, i32 -> vector<2x256xf32>
    %207 = arith.addf %206, %103 : vector<2x256xf32>
    %208 = arith.maximumf %205, %207 : vector<2x256xf32>
    %c16_i32_70 = arith.constant 16 : i32
    %209 = tpu.dynamic_rotate %205 by %c16_i32_70 dim 1 : vector<2x256xf32>, i32 -> vector<2x256xf32>
    %210 = arith.addf %209, %117 : vector<2x256xf32>
    %211 = arith.maximumf %208, %210 : vector<2x256xf32>
    %c240_i32_71 = arith.constant 240 : i32
    %212 = tpu.dynamic_rotate %205 by %c240_i32_71 dim 1 : vector<2x256xf32>, i32 -> vector<2x256xf32>
    %213 = arith.addf %212, %131 : vector<2x256xf32>
    %214 = arith.maximumf %211, %213 : vector<2x256xf32>
    %c224_i32_72 = arith.constant 224 : i32
    %215 = tpu.dynamic_rotate %205 by %c224_i32_72 dim 1 : vector<2x256xf32>, i32 -> vector<2x256xf32>
    %216 = arith.addf %215, %145 : vector<2x256xf32>
    %217 = arith.maximumf %214, %216 : vector<2x256xf32>
    %c0_73 = arith.constant 0 : index
    %c0_74 = arith.constant 0 : index
    %c0_75 = arith.constant 0 : index
    %218 = vector.load %arg4[%c0_73, %c0_74, %c0_75] : memref<4x18x2xbf16, #tpu.memory_space<vmem>>, vector<1x18x2xbf16>
    %219 = vector.shape_cast %218 : vector<1x18x2xbf16> to vector<18x2xbf16>
    %220 = arith.truncf %14 : vector<2x256xf32> to vector<2x256xbf16>
    %cst_76 = arith.constant dense<0.000000e+00> : vector<18x256xf32>
    %221 = tpu.matmul %219, %220, %cst_76 {dimension_numbers = #tpu.dot_dimension_numbers<[1], [0], [0], [1], [0, 0, 1, 1], [], []>} : vector<18x2xbf16>, vector<2x256xbf16>, vector<18x256xf32> -> vector<18x256xf32>
    %c1 = arith.constant 1 : index
    %c0_77 = arith.constant 0 : index
    %c0_78 = arith.constant 0 : index
    %222 = vector.load %arg4[%c1, %c0_77, %c0_78] : memref<4x18x2xbf16, #tpu.memory_space<vmem>>, vector<1x18x2xbf16>
    %223 = vector.shape_cast %222 : vector<1x18x2xbf16> to vector<18x2xbf16>
    %224 = arith.truncf %169 : vector<2x256xf32> to vector<2x256xbf16>
    %cst_79 = arith.constant dense<0.000000e+00> : vector<18x256xf32>
    %225 = tpu.matmul %223, %224, %cst_79 {dimension_numbers = #tpu.dot_dimension_numbers<[1], [0], [0], [1], [0, 0, 1, 1], [], []>} : vector<18x2xbf16>, vector<2x256xbf16>, vector<18x256xf32> -> vector<18x256xf32>
    %226 = arith.addf %221, %225 : vector<18x256xf32>
    %c2 = arith.constant 2 : index
    %c0_80 = arith.constant 0 : index
    %c0_81 = arith.constant 0 : index
    %227 = vector.load %arg4[%c2, %c0_80, %c0_81] : memref<4x18x2xbf16, #tpu.memory_space<vmem>>, vector<1x18x2xbf16>
    %228 = vector.shape_cast %227 : vector<1x18x2xbf16> to vector<18x2xbf16>
    %229 = arith.truncf %193 : vector<2x256xf32> to vector<2x256xbf16>
    %cst_82 = arith.constant dense<0.000000e+00> : vector<18x256xf32>
    %230 = tpu.matmul %228, %229, %cst_82 {dimension_numbers = #tpu.dot_dimension_numbers<[1], [0], [0], [1], [0, 0, 1, 1], [], []>} : vector<18x2xbf16>, vector<2x256xbf16>, vector<18x256xf32> -> vector<18x256xf32>
    %231 = arith.addf %226, %230 : vector<18x256xf32>
    %c3 = arith.constant 3 : index
    %c0_83 = arith.constant 0 : index
    %c0_84 = arith.constant 0 : index
    %232 = vector.load %arg4[%c3, %c0_83, %c0_84] : memref<4x18x2xbf16, #tpu.memory_space<vmem>>, vector<1x18x2xbf16>
    %233 = vector.shape_cast %232 : vector<1x18x2xbf16> to vector<18x2xbf16>
    %234 = arith.truncf %217 : vector<2x256xf32> to vector<2x256xbf16>
    %cst_85 = arith.constant dense<0.000000e+00> : vector<18x256xf32>
    %235 = tpu.matmul %233, %234, %cst_85 {dimension_numbers = #tpu.dot_dimension_numbers<[1], [0], [0], [1], [0, 0, 1, 1], [], []>} : vector<18x2xbf16>, vector<2x256xbf16>, vector<18x256xf32> -> vector<18x256xf32>
    %236 = arith.addf %231, %235 : vector<18x256xf32>
    %c0_86 = arith.constant 0 : index
    %c0_87 = arith.constant 0 : index
    %237 = vector.load %arg5[%c0_86, %c0_87] : memref<18x1xf32, #tpu.memory_space<vmem>>, vector<18x1xf32>
    %238 = vector.broadcast %237 : vector<18x1xf32> to vector<18x256xf32>
    %239 = arith.addf %236, %238 : vector<18x256xf32>
    %240 = vector.extract_strided_slice %239 {offsets = [0, 0], sizes = [8, 256], strides = [1, 1]} : vector<18x256xf32> to vector<8x256xf32>
    %241 = vector.extract_strided_slice %239 {offsets = [8, 0], sizes = [8, 256], strides = [1, 1]} : vector<18x256xf32> to vector<8x256xf32>
    %242 = vector.extract_strided_slice %239 {offsets = [16, 0], sizes = [1, 256], strides = [1, 1]} : vector<18x256xf32> to vector<1x256xf32>
    %cst_88 = arith.constant 5.000000e-01 : f32
    %243 = vector.broadcast %cst_88 : f32 to vector<1x256xf32>
    %244 = arith.mulf %243, %242 : vector<1x256xf32>
    %245 = math.tanh %244 : vector<1x256xf32>
    %cst_89 = arith.constant 1.000000e+00 : f32
    %246 = vector.broadcast %cst_89 : f32 to vector<1x256xf32>
    %247 = arith.addf %245, %246 : vector<1x256xf32>
    %cst_90 = arith.constant 5.000000e-01 : f32
    %248 = vector.broadcast %cst_90 : f32 to vector<1x256xf32>
    %249 = arith.mulf %248, %247 : vector<1x256xf32>
    %250 = vector.extract_strided_slice %239 {offsets = [17, 0], sizes = [1, 256], strides = [1, 1]} : vector<18x256xf32> to vector<1x256xf32>
    %cst_91 = arith.constant 0xFF800000 : f32
    %251 = vector.broadcast %cst_91 : f32 to vector<1x256xf32>
    %252 = arith.select %33, %250, %251 : vector<1x256xi1>, vector<1x256xf32>
    %cst_92 = arith.constant dense<0xFF800000> : vector<1xf32>
    %253 = vector.multi_reduction <maximumf>, %252, %cst_92 [1] : vector<1x256xf32> to vector<1xf32>
    %254 = vector.shape_cast %253 : vector<1xf32> to vector<1x1xf32>
    %255 = vector.broadcast %254 : vector<1x1xf32> to vector<1x256xf32>
    %256 = arith.subf %252, %255 : vector<1x256xf32>
    %257 = math.exp %256 : vector<1x256xf32>
    %cst_93 = arith.constant dense<0.000000e+00> : vector<1xf32>
    %258 = vector.multi_reduction <add>, %257, %cst_93 [1] : vector<1x256xf32> to vector<1xf32>
    %259 = vector.shape_cast %258 : vector<1xf32> to vector<1x1xf32>
    %260 = tpu.reciprocal %259 {approx = true} : vector<1x1xf32> -> vector<1x1xf32>
    %261 = vector.broadcast %260 : vector<1x1xf32> to vector<1x256xf32>
    %262 = arith.mulf %257, %261 : vector<1x256xf32>
    %263 = vector.broadcast %262 : vector<1x256xf32> to vector<8x256xf32>
    %264 = arith.mulf %240, %263 : vector<8x256xf32>
    %cst_94 = arith.constant dense<0.000000e+00> : vector<8xf32>
    %265 = vector.multi_reduction <add>, %264, %cst_94 [1] : vector<8x256xf32> to vector<8xf32>
    %266 = vector.shape_cast %265 : vector<8xf32> to vector<8x1xf32>
    %c0_95 = arith.constant 0 : index
    %c0_96 = arith.constant 0 : index
    %267 = vector.load %arg6[%c0_95, %c0_96] : memref<8x1xf32, #tpu.memory_space<vmem>>, vector<8x1xf32>
    %268 = arith.addf %266, %267 : vector<8x1xf32>
    %269 = vector.broadcast %268 : vector<8x1xf32> to vector<8x256xf32>
    %270 = vector.broadcast %249 : vector<1x256xf32> to vector<8x256xf32>
    %271 = arith.mulf %269, %270 : vector<8x256xf32>
    %272 = arith.addf %241, %271 : vector<8x256xf32>
    %cst_97 = arith.constant 5.000000e-01 : f32
    %273 = vector.broadcast %cst_97 : f32 to vector<8x256xf32>
    %274 = arith.mulf %273, %272 : vector<8x256xf32>
    %275 = math.tanh %274 : vector<8x256xf32>
    %cst_98 = arith.constant 1.000000e+00 : f32
    %276 = vector.broadcast %cst_98 : f32 to vector<8x256xf32>
    %277 = arith.addf %275, %276 : vector<8x256xf32>
    %cst_99 = arith.constant 5.000000e-01 : f32
    %278 = vector.broadcast %cst_99 : f32 to vector<8x256xf32>
    %279 = arith.mulf %278, %277 : vector<8x256xf32>
    %280 = arith.mulf %272, %279 : vector<8x256xf32>
    %c0_100 = arith.constant 0 : index
    %c0_101 = arith.constant 0 : index
    %c0_102 = arith.constant 0 : index
    %281 = vector.load %arg7[%c0_100, %c0_101, %c0_102] : memref<1x8x256xf32, #tpu.memory_space<vmem>>, vector<1x8x256xf32>
    %282 = vector.shape_cast %281 : vector<1x8x256xf32> to vector<8x256xf32>
    %283 = vector.shape_cast %280 : vector<8x256xf32> to vector<1x8x256xf32>
    tpu.vector_store %arg7[%c0_100, %c0_101, %c0_102], %283 {strides = array<i32>} : memref<1x8x256xf32, #tpu.memory_space<vmem>>, vector<1x8x256xf32>,
    return
  }
  func.func @transform_0(%arg0: i32) -> (i32, i32, i32) {
    %c0_i32 = arith.constant 0 : i32
    %c0_i32_0 = arith.constant 0 : i32
    %c0_i32_1 = arith.constant 0 : i32
    return %arg0, %c0_i32, %c0_i32_0 : i32, i32, i32
  }
  func.func @transform_1(%arg0: i32) -> (i32, i32) {
    %c0_i32 = arith.constant 0 : i32
    %c0_i32_0 = arith.constant 0 : i32
    %c0_i32_1 = arith.constant 0 : i32
    return %c0_i32, %c0_i32_0 : i32, i32
  }
  func.func @transform_2(%arg0: i32) -> (i32, i32) {
    %c0_i32 = arith.constant 0 : i32
    %c0_i32_0 = arith.constant 0 : i32
    %c0_i32_1 = arith.constant 0 : i32
    return %c0_i32, %c0_i32_0 : i32, i32
  }
  func.func @transform_3(%arg0: i32) -> (i32, i32, i32) {
    %c0_i32 = arith.constant 0 : i32
    %c0_i32_0 = arith.constant 0 : i32
    %c0_i32_1 = arith.constant 0 : i32
    %c0_i32_2 = arith.constant 0 : i32
    return %c0_i32, %c0_i32_0, %c0_i32_1 : i32, i32, i32
  }
  func.func @transform_4(%arg0: i32) -> (i32, i32) {
    %c0_i32 = arith.constant 0 : i32
    %c0_i32_0 = arith.constant 0 : i32
    %c0_i32_1 = arith.constant 0 : i32
    return %c0_i32, %c0_i32_0 : i32, i32
  }
  func.func @transform_5(%arg0: i32) -> (i32, i32) {
    %c0_i32 = arith.constant 0 : i32
    %c0_i32_0 = arith.constant 0 : i32
    %c0_i32_1 = arith.constant 0 : i32
    return %c0_i32, %c0_i32_0 : i32, i32
  }
  func.func @transform_6(%arg0: i32) -> (i32, i32, i32) {
    %c0_i32 = arith.constant 0 : i32
    %c0_i32_0 = arith.constant 0 : i32
    %c0_i32_1 = arith.constant 0 : i32
    return %arg0, %c0_i32, %c0_i32_0 : i32, i32, i32
  }
}

module attributes {stable_mosaic.version = 11 : i64} {
  func.func @sppf_attention_kernel(%arg0: i32, %arg1: memref<1x4x256xbf16, #tpu.memory_space<vmem>>, %arg2: memref<2x4xbf16, #tpu.memory_space<vmem>>, %arg3: memref<2x1xf32, #tpu.memory_space<vmem>>, %arg4: memref<4x18x2xbf16, #tpu.memory_space<vmem>>, %arg5: memref<18x1xf32, #tpu.memory_space<vmem>>, %arg6: memref<8x1xf32, #tpu.memory_space<vmem>>, %arg7: memref<1x8x256xf32, #tpu.memory_space<vmem>>) attributes {dimension_semantics = [#tpu.dimension_semantics<parallel>], iteration_bounds = array<i64: 2>, scalar_prefetch = 0 : i64, scratch_operands = 0 : i64, tpu.core_type = #tpu.core_type<tc>, window_params = [{transform_indices = @transform_0, window_bounds = array<i64: 1, 4, 256>}, {pipeline_mode = #tpu.pipeline_mode<synchronous>, transform_indices = @transform_1, window_bounds = array<i64: 2, 4>}, {pipeline_mode = #tpu.pipeline_mode<synchronous>, transform_indices = @transform_2, window_bounds = array<i64: 2, 1>}, {pipeline_mode = #tpu.pipeline_mode<synchronous>, transform_indices = @transform_3, window_bounds = array<i64: 4, 18, 2>}, {pipeline_mode = #tpu.pipeline_mode<synchronous>, transform_indices = @transform_4, window_bounds = array<i64: 18, 1>}, {pipeline_mode = #tpu.pipeline_mode<synchronous>, transform_indices = @transform_5, window_bounds = array<i64: 8, 1>}, {transform_indices = @transform_6, window_bounds = array<i64: 1, 8, 256>}]} {
    %c0 = arith.constant 0 : index
    %c0_0 = arith.constant 0 : index
    %c0_1 = arith.constant 0 : index
    %0 = vector.load %arg1[%c0, %c0_0, %c0_1] : memref<1x4x256xbf16, #tpu.memory_space<vmem>>, vector<1x4x256xbf16>
    %1 = vector.shape_cast %0 : vector<1x4x256xbf16> to vector<4x256xbf16>
    %c0_2 = arith.constant 0 : index
    %c0_3 = arith.constant 0 : index
    %2 = vector.load %arg2[%c0_2, %c0_3] : memref<2x4xbf16, #tpu.memory_space<vmem>>, vector<2x4xbf16>
    %cst = arith.constant dense<0.000000e+00> : vector<2x256xf32>
    %3 = tpu.matmul %2, %1, %cst {dimension_numbers = #tpu.dot_dimension_numbers<[1], [0], [0], [1], [0, 0, 1, 1], [], []>} : vector<2x4xbf16>, vector<4x256xbf16>, vector<2x256xf32> -> vector<2x256xf32>
    %c0_4 = arith.constant 0 : index
    %c0_5 = arith.constant 0 : index
    %4 = vector.load %arg3[%c0_4, %c0_5] : memref<2x1xf32, #tpu.memory_space<vmem>>, vector<2x1xf32>
    %5 = vector.broadcast %4 : vector<2x1xf32> to vector<2x256xf32>
    %6 = arith.addf %3, %5 : vector<2x256xf32>
    %cst_6 = arith.constant 5.000000e-01 : f32
    %7 = vector.broadcast %cst_6 : f32 to vector<2x256xf32>
    %8 = arith.mulf %7, %6 : vector<2x256xf32>
    %9 = math.tanh %8 : vector<2x256xf32>
    %cst_7 = arith.constant 1.000000e+00 : f32
    %10 = vector.broadcast %cst_7 : f32 to vector<2x256xf32>
    %11 = arith.addf %9, %10 : vector<2x256xf32>
    %cst_8 = arith.constant 5.000000e-01 : f32
    %12 = vector.broadcast %cst_8 : f32 to vector<2x256xf32>
    %13 = arith.mulf %12, %11 : vector<2x256xf32>
    %14 = arith.mulf %6, %13 : vector<2x256xf32>
    %15 = tpu.iota {dimensions = array<i32: 1>} : vector<1x256xi32>
    %c16_i32 = arith.constant 16 : i32
    %c0_i32 = arith.constant 0 : i32
    %16 = arith.cmpi eq, %c16_i32, %c0_i32 : i32
    %c1_i32 = arith.constant 1 : i32
    %17 = arith.select %16, %c1_i32, %c16_i32 : i32
    %18 = vector.broadcast %17 : i32 to vector<1x256xi32>
    %19 = arith.remsi %15, %18 : vector<1x256xi32>
    %c0_i32_9 = arith.constant 0 : i32
    %20 = vector.broadcast %c0_i32_9 : i32 to vector<1x256xi32>
    %21 = arith.cmpi ne, %19, %20 : vector<1x256xi32>
    %c0_i32_10 = arith.constant 0 : i32
    %22 = vector.broadcast %c0_i32_10 : i32 to vector<1x256xi32>
    %23 = arith.cmpi slt, %19, %22 : vector<1x256xi32>
    %c0_i32_11 = arith.constant 0 : i32
    %24 = arith.cmpi slt, %17, %c0_i32_11 : i32
    %25 = vector.broadcast %24 : i1 to vector<1x256xi1>
    %26 = vector.broadcast %25 : vector<1x256xi1> to vector<1x256xi1>
    %27 = arith.xori %23, %26 : vector<1x256xi1>
    %28 = arith.andi %27, %21 : vector<1x256xi1>
    %29 = vector.broadcast %17 : i32 to vector<1x256xi32>
    %30 = arith.addi %19, %29 : vector<1x256xi32>
    %31 = arith.select %28, %30, %19 : vector<1x256xi1>, vector<1x256xi32>
    %c256_i32 = arith.constant 256 : i32
    %32 = vector.broadcast %c256_i32 : i32 to vector<1x256xi32>
    %33 = arith.cmpi slt, %15, %32 : vector<1x256xi32>
    %c-2_i32 = arith.constant -2 : i32
    %34 = vector.broadcast %c-2_i32 : i32 to vector<1x256xi32>
    %35 = arith.addi %31, %34 : vector<1x256xi32>
    %c0_i32_12 = arith.constant 0 : i32
    %36 = vector.broadcast %c0_i32_12 : i32 to vector<1x256xi32>
    %37 = arith.cmpi sge, %35, %36 : vector<1x256xi32>
    %c-2_i32_13 = arith.constant -2 : i32
    %38 = vector.broadcast %c-2_i32_13 : i32 to vector<1x256xi32>
    %39 = arith.addi %31, %38 : vector<1x256xi32>
    %c15_i32 = arith.constant 15 : i32
    %40 = vector.broadcast %c15_i32 : i32 to vector<1x256xi32>
    %41 = arith.cmpi sle, %39, %40 : vector<1x256xi32>
    %42 = arith.andi %37, %41 : vector<1x256xi1>
    %cst_14 = arith.constant 0.000000e+00 : f32
    %cst_15 = arith.constant 0xFF800000 : f32
    %43 = vector.broadcast %cst_14 : f32 to vector<1x256xf32>
    %44 = vector.broadcast %cst_15 : f32 to vector<1x256xf32>
    %45 = arith.select %42, %43, %44 : vector<1x256xi1>, vector<1x256xf32>
    %46 = vector.shape_cast %45 : vector<1x256xf32> to vector<1x256xf32>
    %47 = vector.broadcast %46 : vector<1x256xf32> to vector<2x256xf32>
    %c-1_i32 = arith.constant -1 : i32
    %48 = vector.broadcast %c-1_i32 : i32 to vector<1x256xi32>
    %49 = arith.addi %31, %48 : vector<1x256xi32>
    %c0_i32_16 = arith.constant 0 : i32
    %50 = vector.broadcast %c0_i32_16 : i32 to vector<1x256xi32>
    %51 = arith.cmpi sge, %49, %50 : vector<1x256xi32>
    %c-1_i32_17 = arith.constant -1 : i32
    %52 = vector.broadcast %c-1_i32_17 : i32 to vector<1x256xi32>
    %53 = arith.addi %31, %52 : vector<1x256xi32>
    %c15_i32_18 = arith.constant 15 : i32
    %54 = vector.broadcast %c15_i32_18 : i32 to vector<1x256xi32>
    %55 = arith.cmpi sle, %53, %54 : vector<1x256xi32>
    %56 = arith.andi %51, %55 : vector<1x256xi1>
    %cst_19 = arith.constant 0.000000e+00 : f32
    %cst_20 = arith.constant 0xFF800000 : f32
    %57 = vector.broadcast %cst_19 : f32 to vector<1x256xf32>
    %58 = vector.broadcast %cst_20 : f32 to vector<1x256xf32>
    %59 = arith.select %56, %57, %58 : vector<1x256xi1>, vector<1x256xf32>
    %60 = vector.shape_cast %59 : vector<1x256xf32> to vector<1x256xf32>
    %61 = vector.broadcast %60 : vector<1x256xf32> to vector<2x256xf32>
    %c1_i32_21 = arith.constant 1 : i32
    %62 = vector.broadcast %c1_i32_21 : i32 to vector<1x256xi32>
    %63 = arith.addi %31, %62 : vector<1x256xi32>
    %c0_i32_22 = arith.constant 0 : i32
    %64 = vector.broadcast %c0_i32_22 : i32 to vector<1x256xi32>
    %65 = arith.cmpi sge, %63, %64 : vector<1x256xi32>
    %c1_i32_23 = arith.constant 1 : i32
    %66 = vector.broadcast %c1_i32_23 : i32 to vector<1x256xi32>
    %67 = arith.addi %31, %66 : vector<1x256xi32>
    %c15_i32_24 = arith.constant 15 : i32
    %68 = vector.broadcast %c15_i32_24 : i32 to vector<1x256xi32>
    %69 = arith.cmpi sle, %67, %68 : vector<1x256xi32>
    %70 = arith.andi %65, %69 : vector<1x256xi1>
    %cst_25 = arith.constant 0.000000e+00 : f32
    %cst_26 = arith.constant 0xFF800000 : f32
    %71 = vector.broadcast %cst_25 : f32 to vector<1x256xf32>
    %72 = vector.broadcast %cst_26 : f32 to vector<1x256xf32>
    %73 = arith.select %70, %71, %72 : vector<1x256xi1>, vector<1x256xf32>
    %74 = vector.shape_cast %73 : vector<1x256xf32> to vector<1x256xf32>
    %75 = vector.broadcast %74 : vector<1x256xf32> to vector<2x256xf32>
    %c2_i32 = arith.constant 2 : i32
    %76 = vector.broadcast %c2_i32 : i32 to vector<1x256xi32>
    %77 = arith.addi %31, %76 : vector<1x256xi32>
    %c0_i32_27 = arith.constant 0 : i32
    %78 = vector.broadcast %c0_i32_27 : i32 to vector<1x256xi32>
    %79 = arith.cmpi sge, %77, %78 : vector<1x256xi32>
    %c2_i32_28 = arith.constant 2 : i32
    %80 = vector.broadcast %c2_i32_28 : i32 to vector<1x256xi32>
    %81 = arith.addi %31, %80 : vector<1x256xi32>
    %c15_i32_29 = arith.constant 15 : i32
    %82 = vector.broadcast %c15_i32_29 : i32 to vector<1x256xi32>
    %83 = arith.cmpi sle, %81, %82 : vector<1x256xi32>
    %84 = arith.andi %79, %83 : vector<1x256xi1>
    %cst_30 = arith.constant 0.000000e+00 : f32
    %cst_31 = arith.constant 0xFF800000 : f32
    %85 = vector.broadcast %cst_30 : f32 to vector<1x256xf32>
    %86 = vector.broadcast %cst_31 : f32 to vector<1x256xf32>
    %87 = arith.select %84, %85, %86 : vector<1x256xi1>, vector<1x256xf32>
    %88 = vector.shape_cast %87 : vector<1x256xf32> to vector<1x256xf32>
    %89 = vector.broadcast %88 : vector<1x256xf32> to vector<2x256xf32>
    %c-32_i32 = arith.constant -32 : i32
    %90 = vector.broadcast %c-32_i32 : i32 to vector<1x256xi32>
    %91 = arith.addi %15, %90 : vector<1x256xi32>
    %c0_i32_32 = arith.constant 0 : i32
    %92 = vector.broadcast %c0_i32_32 : i32 to vector<1x256xi32>
    %93 = arith.cmpi sge, %91, %92 : vector<1x256xi32>
    %c-32_i32_33 = arith.constant -32 : i32
    %94 = vector.broadcast %c-32_i32_33 : i32 to vector<1x256xi32>
    %95 = arith.addi %15, %94 : vector<1x256xi32>
    %c255_i32 = arith.constant 255 : i32
    %96 = vector.broadcast %c255_i32 : i32 to vector<1x256xi32>
    %97 = arith.cmpi sle, %95, %96 : vector<1x256xi32>
    %98 = arith.andi %93, %97 : vector<1x256xi1>
    %cst_34 = arith.constant 0.000000e+00 : f32
    %cst_35 = arith.constant 0xFF800000 : f32
    %99 = vector.broadcast %cst_34 : f32 to vector<1x256xf32>
    %100 = vector.broadcast %cst_35 : f32 to vector<1x256xf32>
    %101 = arith.select %98, %99, %100 : vector<1x256xi1>, vector<1x256xf32>
    %102 = vector.shape_cast %101 : vector<1x256xf32> to vector<1x256xf32>
    %103 = vector.broadcast %102 : vector<1x256xf32> to vector<2x256xf32>
    %c-16_i32 = arith.constant -16 : i32
    %104 = vector.broadcast %c-16_i32 : i32 to vector<1x256xi32>
    %105 = arith.addi %15, %104 : vector<1x256xi32>
    %c0_i32_36 = arith.constant 0 : i32
    %106 = vector.broadcast %c0_i32_36 : i32 to vector<1x256xi32>
    %107 = arith.cmpi sge, %105, %106 : vector<1x256xi32>
    %c-16_i32_37 = arith.constant -16 : i32
    %108 = vector.broadcast %c-16_i32_37 : i32 to vector<1x256xi32>
    %109 = arith.addi %15, %108 : vector<1x256xi32>
    %c255_i32_38 = arith.constant 255 : i32
    %110 = vector.broadcast %c255_i32_38 : i32 to vector<1x256xi32>
    %111 = arith.cmpi sle, %109, %110 : vector<1x256xi32>
    %112 = arith.andi %107, %111 : vector<1x256xi1>
    %cst_39 = arith.constant 0.000000e+00 : f32
    %cst_40 = arith.constant 0xFF800000 : f32
    %113 = vector.broadcast %cst_39 : f32 to vector<1x256xf32>
    %114 = vector.broadcast %cst_40 : f32 to vector<1x256xf32>
    %115 = arith.select %112, %113, %114 : vector<1x256xi1>, vector<1x256xf32>
    %116 = vector.shape_cast %115 : vector<1x256xf32> to vector<1x256xf32>
    %117 = vector.broadcast %116 : vector<1x256xf32> to vector<2x256xf32>
    %c16_i32_41 = arith.constant 16 : i32
    %118 = vector.broadcast %c16_i32_41 : i32 to vector<1x256xi32>
    %119 = arith.addi %15, %118 : vector<1x256xi32>
    %c0_i32_42 = arith.constant 0 : i32
    %120 = vector.broadcast %c0_i32_42 : i32 to vector<1x256xi32>
    %121 = arith.cmpi sge, %119, %120 : vector<1x256xi32>
    %c16_i32_43 = arith.constant 16 : i32
    %122 = vector.broadcast %c16_i32_43 : i32 to vector<1x256xi32>
    %123 = arith.addi %15, %122 : vector<1x256xi32>
    %c255_i32_44 = arith.constant 255 : i32
    %124 = vector.broadcast %c255_i32_44 : i32 to vector<1x256xi32>
    %125 = arith.cmpi sle, %123, %124 : vector<1x256xi32>
    %126 = arith.andi %121, %125 : vector<1x256xi1>
    %cst_45 = arith.constant 0.000000e+00 : f32
    %cst_46 = arith.constant 0xFF800000 : f32
    %127 = vector.broadcast %cst_45 : f32 to vector<1x256xf32>
    %128 = vector.broadcast %cst_46 : f32 to vector<1x256xf32>
    %129 = arith.select %126, %127, %128 : vector<1x256xi1>, vector<1x256xf32>
    %130 = vector.shape_cast %129 : vector<1x256xf32> to vector<1x256xf32>
    %131 = vector.broadcast %130 : vector<1x256xf32> to vector<2x256xf32>
    %c32_i32 = arith.constant 32 : i32
    %132 = vector.broadcast %c32_i32 : i32 to vector<1x256xi32>
    %133 = arith.addi %15, %132 : vector<1x256xi32>
    %c0_i32_47 = arith.constant 0 : i32
    %134 = vector.broadcast %c0_i32_47 : i32 to vector<1x256xi32>
    %135 = arith.cmpi sge, %133, %134 : vector<1x256xi32>
    %c32_i32_48 = arith.constant 32 : i32
    %136 = vector.broadcast %c32_i32_48 : i32 to vector<1x256xi32>
    %137 = arith.addi %15, %136 : vector<1x256xi32>
    %c255_i32_49 = arith.constant 255 : i32
    %138 = vector.broadcast %c255_i32_49 : i32 to vector<1x256xi32>
    %139 = arith.cmpi sle, %137, %138 : vector<1x256xi32>
    %140 = arith.andi %135, %139 : vector<1x256xi1>
    %cst_50 = arith.constant 0.000000e+00 : f32
    %cst_51 = arith.constant 0xFF800000 : f32
    %141 = vector.broadcast %cst_50 : f32 to vector<1x256xf32>
    %142 = vector.broadcast %cst_51 : f32 to vector<1x256xf32>
    %143 = arith.select %140, %141, %142 : vector<1x256xi1>, vector<1x256xf32>
    %144 = vector.shape_cast %143 : vector<1x256xf32> to vector<1x256xf32>
    %145 = vector.broadcast %144 : vector<1x256xf32> to vector<2x256xf32>
    %c2_i32_52 = arith.constant 2 : i32
    %146 = tpu.dynamic_rotate %14 by %c2_i32_52 dim 1 : vector<2x256xf32>, i32 -> vector<2x256xf32>
    %147 = arith.addf %146, %47 : vector<2x256xf32>
    %148 = arith.maximumf %14, %147 : vector<2x256xf32>
    %c1_i32_53 = arith.constant 1 : i32
    %149 = tpu.dynamic_rotate %14 by %c1_i32_53 dim 1 : vector<2x256xf32>, i32 -> vector<2x256xf32>
    %150 = arith.addf %149, %61 : vector<2x256xf32>
    %151 = arith.maximumf %148, %150 : vector<2x256xf32>
    %c255_i32_54 = arith.constant 255 : i32
    %152 = tpu.dynamic_rotate %14 by %c255_i32_54 dim 1 : vector<2x256xf32>, i32 -> vector<2x256xf32>
    %153 = arith.addf %152, %75 : vector<2x256xf32>
    %154 = arith.maximumf %151, %153 : vector<2x256xf32>
    %c254_i32 = arith.constant 254 : i32
    %155 = tpu.dynamic_rotate %14 by %c254_i32 dim 1 : vector<2x256xf32>, i32 -> vector<2x256xf32>
    %156 = arith.addf %155, %89 : vector<2x256xf32>
    %157 = arith.maximumf %154, %156 : vector<2x256xf32>
    %c32_i32_55 = arith.constant 32 : i32
    %158 = tpu.dynamic_rotate %157 by %c32_i32_55 dim 1 : vector<2x256xf32>, i32 -> vector<2x256xf32>
    %159 = arith.addf %158, %103 : vector<2x256xf32>
    %160 = arith.maximumf %157, %159 : vector<2x256xf32>
    %c16_i32_56 = arith.constant 16 : i32
    %161 = tpu.dynamic_rotate %157 by %c16_i32_56 dim 1 : vector<2x256xf32>, i32 -> vector<2x256xf32>
    %162 = arith.addf %161, %117 : vector<2x256xf32>
    %163 = arith.maximumf %160, %162 : vector<2x256xf32>
    %c240_i32 = arith.constant 240 : i32
    %164 = tpu.dynamic_rotate %157 by %c240_i32 dim 1 : vector<2x256xf32>, i32 -> vector<2x256xf32>
    %165 = arith.addf %164, %131 : vector<2x256xf32>
    %166 = arith.maximumf %163, %165 : vector<2x256xf32>
    %c224_i32 = arith.constant 224 : i32
    %167 = tpu.dynamic_rotate %157 by %c224_i32 dim 1 : vector<2x256xf32>, i32 -> vector<2x256xf32>
    %168 = arith.addf %167, %145 : vector<2x256xf32>
    %169 = arith.maximumf %166, %168 : vector<2x256xf32>
    %c2_i32_57 = arith.constant 2 : i32
    %170 = tpu.dynamic_rotate %169 by %c2_i32_57 dim 1 : vector<2x256xf32>, i32 -> vector<2x256xf32>
    %171 = arith.addf %170, %47 : vector<2x256xf32>
    %172 = arith.maximumf %169, %171 : vector<2x256xf32>
    %c1_i32_58 = arith.constant 1 : i32
    %173 = tpu.dynamic_rotate %169 by %c1_i32_58 dim 1 : vector<2x256xf32>, i32 -> vector<2x256xf32>
    %174 = arith.addf %173, %61 : vector<2x256xf32>
    %175 = arith.maximumf %172, %174 : vector<2x256xf32>
    %c255_i32_59 = arith.constant 255 : i32
    %176 = tpu.dynamic_rotate %169 by %c255_i32_59 dim 1 : vector<2x256xf32>, i32 -> vector<2x256xf32>
    %177 = arith.addf %176, %75 : vector<2x256xf32>
    %178 = arith.maximumf %175, %177 : vector<2x256xf32>
    %c254_i32_60 = arith.constant 254 : i32
    %179 = tpu.dynamic_rotate %169 by %c254_i32_60 dim 1 : vector<2x256xf32>, i32 -> vector<2x256xf32>
    %180 = arith.addf %179, %89 : vector<2x256xf32>
    %181 = arith.maximumf %178, %180 : vector<2x256xf32>
    %c32_i32_61 = arith.constant 32 : i32
    %182 = tpu.dynamic_rotate %181 by %c32_i32_61 dim 1 : vector<2x256xf32>, i32 -> vector<2x256xf32>
    %183 = arith.addf %182, %103 : vector<2x256xf32>
    %184 = arith.maximumf %181, %183 : vector<2x256xf32>
    %c16_i32_62 = arith.constant 16 : i32
    %185 = tpu.dynamic_rotate %181 by %c16_i32_62 dim 1 : vector<2x256xf32>, i32 -> vector<2x256xf32>
    %186 = arith.addf %185, %117 : vector<2x256xf32>
    %187 = arith.maximumf %184, %186 : vector<2x256xf32>
    %c240_i32_63 = arith.constant 240 : i32
    %188 = tpu.dynamic_rotate %181 by %c240_i32_63 dim 1 : vector<2x256xf32>, i32 -> vector<2x256xf32>
    %189 = arith.addf %188, %131 : vector<2x256xf32>
    %190 = arith.maximumf %187, %189 : vector<2x256xf32>
    %c224_i32_64 = arith.constant 224 : i32
    %191 = tpu.dynamic_rotate %181 by %c224_i32_64 dim 1 : vector<2x256xf32>, i32 -> vector<2x256xf32>
    %192 = arith.addf %191, %145 : vector<2x256xf32>
    %193 = arith.maximumf %190, %192 : vector<2x256xf32>
    %c2_i32_65 = arith.constant 2 : i32
    %194 = tpu.dynamic_rotate %193 by %c2_i32_65 dim 1 : vector<2x256xf32>, i32 -> vector<2x256xf32>
    %195 = arith.addf %194, %47 : vector<2x256xf32>
    %196 = arith.maximumf %193, %195 : vector<2x256xf32>
    %c1_i32_66 = arith.constant 1 : i32
    %197 = tpu.dynamic_rotate %193 by %c1_i32_66 dim 1 : vector<2x256xf32>, i32 -> vector<2x256xf32>
    %198 = arith.addf %197, %61 : vector<2x256xf32>
    %199 = arith.maximumf %196, %198 : vector<2x256xf32>
    %c255_i32_67 = arith.constant 255 : i32
    %200 = tpu.dynamic_rotate %193 by %c255_i32_67 dim 1 : vector<2x256xf32>, i32 -> vector<2x256xf32>
    %201 = arith.addf %200, %75 : vector<2x256xf32>
    %202 = arith.maximumf %199, %201 : vector<2x256xf32>
    %c254_i32_68 = arith.constant 254 : i32
    %203 = tpu.dynamic_rotate %193 by %c254_i32_68 dim 1 : vector<2x256xf32>, i32 -> vector<2x256xf32>
    %204 = arith.addf %203, %89 : vector<2x256xf32>
    %205 = arith.maximumf %202, %204 : vector<2x256xf32>
    %c32_i32_69 = arith.constant 32 : i32
    %206 = tpu.dynamic_rotate %205 by %c32_i32_69 dim 1 : vector<2x256xf32>, i32 -> vector<2x256xf32>
    %207 = arith.addf %206, %103 : vector<2x256xf32>
    %208 = arith.maximumf %205, %207 : vector<2x256xf32>
    %c16_i32_70 = arith.constant 16 : i32
    %209 = tpu.dynamic_rotate %205 by %c16_i32_70 dim 1 : vector<2x256xf32>, i32 -> vector<2x256xf32>
    %210 = arith.addf %209, %117 : vector<2x256xf32>
    %211 = arith.maximumf %208, %210 : vector<2x256xf32>
    %c240_i32_71 = arith.constant 240 : i32
    %212 = tpu.dynamic_rotate %205 by %c240_i32_71 dim 1 : vector<2x256xf32>, i32 -> vector<2x256xf32>
    %213 = arith.addf %212, %131 : vector<2x256xf32>
    %214 = arith.maximumf %211, %213 : vector<2x256xf32>
    %c224_i32_72 = arith.constant 224 : i32
    %215 = tpu.dynamic_rotate %205 by %c224_i32_72 dim 1 : vector<2x256xf32>, i32 -> vector<2x256xf32>
    %216 = arith.addf %215, %145 : vector<2x256xf32>
    %217 = arith.maximumf %214, %216 : vector<2x256xf32>
    %c0_73 = arith.constant 0 : index
    %c0_74 = arith.constant 0 : index
    %c0_75 = arith.constant 0 : index
    %218 = vector.load %arg4[%c0_73, %c0_74, %c0_75] : memref<4x18x2xbf16, #tpu.memory_space<vmem>>, vector<1x18x2xbf16>
    %219 = vector.shape_cast %218 : vector<1x18x2xbf16> to vector<18x2xbf16>
    %220 = arith.truncf %14 : vector<2x256xf32> to vector<2x256xbf16>
    %cst_76 = arith.constant dense<0.000000e+00> : vector<18x256xf32>
    %221 = tpu.matmul %219, %220, %cst_76 {dimension_numbers = #tpu.dot_dimension_numbers<[1], [0], [0], [1], [0, 0, 1, 1], [], []>} : vector<18x2xbf16>, vector<2x256xbf16>, vector<18x256xf32> -> vector<18x256xf32>
    %c1 = arith.constant 1 : index
    %c0_77 = arith.constant 0 : index
    %c0_78 = arith.constant 0 : index
    %222 = vector.load %arg4[%c1, %c0_77, %c0_78] : memref<4x18x2xbf16, #tpu.memory_space<vmem>>, vector<1x18x2xbf16>
    %223 = vector.shape_cast %222 : vector<1x18x2xbf16> to vector<18x2xbf16>
    %224 = arith.truncf %169 : vector<2x256xf32> to vector<2x256xbf16>
    %cst_79 = arith.constant dense<0.000000e+00> : vector<18x256xf32>
    %225 = tpu.matmul %223, %224, %cst_79 {dimension_numbers = #tpu.dot_dimension_numbers<[1], [0], [0], [1], [0, 0, 1, 1], [], []>} : vector<18x2xbf16>, vector<2x256xbf16>, vector<18x256xf32> -> vector<18x256xf32>
    %226 = arith.addf %221, %225 : vector<18x256xf32>
    %c2 = arith.constant 2 : index
    %c0_80 = arith.constant 0 : index
    %c0_81 = arith.constant 0 : index
    %227 = vector.load %arg4[%c2, %c0_80, %c0_81] : memref<4x18x2xbf16, #tpu.memory_space<vmem>>, vector<1x18x2xbf16>
    %228 = vector.shape_cast %227 : vector<1x18x2xbf16> to vector<18x2xbf16>
    %229 = arith.truncf %193 : vector<2x256xf32> to vector<2x256xbf16>
    %cst_82 = arith.constant dense<0.000000e+00> : vector<18x256xf32>
    %230 = tpu.matmul %228, %229, %cst_82 {dimension_numbers = #tpu.dot_dimension_numbers<[1], [0], [0], [1], [0, 0, 1, 1], [], []>} : vector<18x2xbf16>, vector<2x256xbf16>, vector<18x256xf32> -> vector<18x256xf32>
    %231 = arith.addf %226, %230 : vector<18x256xf32>
    %c3 = arith.constant 3 : index
    %c0_83 = arith.constant 0 : index
    %c0_84 = arith.constant 0 : index
    %232 = vector.load %arg4[%c3, %c0_83, %c0_84] : memref<4x18x2xbf16, #tpu.memory_space<vmem>>, vector<1x18x2xbf16>
    %233 = vector.shape_cast %232 : vector<1x18x2xbf16> to vector<18x2xbf16>
    %234 = arith.truncf %217 : vector<2x256xf32> to vector<2x256xbf16>
    %cst_85 = arith.constant dense<0.000000e+00> : vector<18x256xf32>
    %235 = tpu.matmul %233, %234, %cst_85 {dimension_numbers = #tpu.dot_dimension_numbers<[1], [0], [0], [1], [0, 0, 1, 1], [], []>} : vector<18x2xbf16>, vector<2x256xbf16>, vector<18x256xf32> -> vector<18x256xf32>
    %236 = arith.addf %231, %235 : vector<18x256xf32>
    %c0_86 = arith.constant 0 : index
    %c0_87 = arith.constant 0 : index
    %237 = vector.load %arg5[%c0_86, %c0_87] : memref<18x1xf32, #tpu.memory_space<vmem>>, vector<18x1xf32>
    %238 = vector.broadcast %237 : vector<18x1xf32> to vector<18x256xf32>
    %239 = arith.addf %236, %238 : vector<18x256xf32>
    %240 = vector.extract_strided_slice %239 {offsets = [0, 0], sizes = [8, 256], strides = [1, 1]} : vector<18x256xf32> to vector<8x256xf32>
    %241 = vector.extract_strided_slice %239 {offsets = [8, 0], sizes = [8, 256], strides = [1, 1]} : vector<18x256xf32> to vector<8x256xf32>
    %242 = vector.extract_strided_slice %239 {offsets = [16, 0], sizes = [1, 256], strides = [1, 1]} : vector<18x256xf32> to vector<1x256xf32>
    %cst_88 = arith.constant 5.000000e-01 : f32
    %243 = vector.broadcast %cst_88 : f32 to vector<1x256xf32>
    %244 = arith.mulf %243, %242 : vector<1x256xf32>
    %245 = math.tanh %244 : vector<1x256xf32>
    %cst_89 = arith.constant 1.000000e+00 : f32
    %246 = vector.broadcast %cst_89 : f32 to vector<1x256xf32>
    %247 = arith.addf %245, %246 : vector<1x256xf32>
    %cst_90 = arith.constant 5.000000e-01 : f32
    %248 = vector.broadcast %cst_90 : f32 to vector<1x256xf32>
    %249 = arith.mulf %248, %247 : vector<1x256xf32>
    %250 = vector.extract_strided_slice %239 {offsets = [17, 0], sizes = [1, 256], strides = [1, 1]} : vector<18x256xf32> to vector<1x256xf32>
    %cst_91 = arith.constant 0xFF800000 : f32
    %251 = vector.broadcast %cst_91 : f32 to vector<1x256xf32>
    %252 = arith.select %33, %250, %251 : vector<1x256xi1>, vector<1x256xf32>
    %cst_92 = arith.constant dense<0xFF800000> : vector<1xf32>
    %253 = vector.multi_reduction <maximumf>, %252, %cst_92 [1] : vector<1x256xf32> to vector<1xf32>
    %254 = vector.shape_cast %253 : vector<1xf32> to vector<1x1xf32>
    %255 = vector.broadcast %254 : vector<1x1xf32> to vector<1x256xf32>
    %256 = arith.subf %252, %255 : vector<1x256xf32>
    %257 = math.exp %256 : vector<1x256xf32>
    %cst_93 = arith.constant dense<0.000000e+00> : vector<1xf32>
    %258 = vector.multi_reduction <add>, %257, %cst_93 [1] : vector<1x256xf32> to vector<1xf32>
    %259 = vector.shape_cast %258 : vector<1xf32> to vector<1x1xf32>
    %260 = tpu.reciprocal %259 {approx = true} : vector<1x1xf32> -> vector<1x1xf32>
    %261 = vector.broadcast %260 : vector<1x1xf32> to vector<1x256xf32>
    %262 = arith.mulf %257, %261 : vector<1x256xf32>
    %263 = vector.broadcast %262 : vector<1x256xf32> to vector<8x256xf32>
    %264 = arith.mulf %240, %263 : vector<8x256xf32>
    %cst_94 = arith.constant dense<0.000000e+00> : vector<8xf32>
    %265 = vector.multi_reduction <add>, %264, %cst_94 [1] : vector<8x256xf32> to vector<8xf32>
    %266 = vector.shape_cast %265 : vector<8xf32> to vector<8x1xf32>
    %c0_95 = arith.constant 0 : index
    %c0_96 = arith.constant 0 : index
    %267 = vector.load %arg6[%c0_95, %c0_96] : memref<8x1xf32, #tpu.memory_space<vmem>>, vector<8x1xf32>
    %268 = arith.addf %266, %267 : vector<8x1xf32>
    %269 = vector.broadcast %268 : vector<8x1xf32> to vector<8x256xf32>
    %270 = vector.broadcast %249 : vector<1x256xf32> to vector<8x256xf32>
    %271 = arith.mulf %269, %270 : vector<8x256xf32>
    %272 = arith.addf %241, %271 : vector<8x256xf32>
    %cst_97 = arith.constant 5.000000e-01 : f32
    %273 = vector.broadcast %cst_97 : f32 to vector<8x256xf32>
    %274 = arith.mulf %273, %272 : vector<8x256xf32>
    %275 = math.tanh %274 : vector<8x256xf32>
    %cst_98 = arith.constant 1.000000e+00 : f32
    %276 = vector.broadcast %cst_98 : f32 to vector<8x256xf32>
    %277 = arith.addf %275, %276 : vector<8x256xf32>
    %cst_99 = arith.constant 5.000000e-01 : f32
    %278 = vector.broadcast %cst_99 : f32 to vector<8x256xf32>
    %279 = arith.mulf %278, %277 : vector<8x256xf32>
    %280 = arith.mulf %272, %279 : vector<8x256xf32>
    %c0_100 = arith.constant 0 : index
    %c0_101 = arith.constant 0 : index
    %c0_102 = arith.constant 0 : index
    %281 = vector.load %arg7[%c0_100, %c0_101, %c0_102] : memref<1x8x256xf32, #tpu.memory_space<vmem>>, vector<1x8x256xf32>
    %282 = vector.shape_cast %281 : vector<1x8x256xf32> to vector<8x256xf32>
    %283 = vector.shape_cast %280 : vector<8x256xf32> to vector<1x8x256xf32>
    tpu.vector_store %arg7[%c0_100, %c0_101, %c0_102], %283 {strides = array<i32>} : memref<1x8x256xf32, #tpu.memory_space<vmem>>, vector<1x8x256xf32>,
    return
  }
  func.func @transform_0(%arg0: i32) -> (i32, i32, i32) {
    %c0_i32 = arith.constant 0 : i32
    %c0_i32_0 = arith.constant 0 : i32
    %c0_i32_1 = arith.constant 0 : i32
    return %arg0, %c0_i32, %c0_i32_0 : i32, i32, i32
  }
  func.func @transform_1(%arg0: i32) -> (i32, i32) {
    %c0_i32 = arith.constant 0 : i32
    %c0_i32_0 = arith.constant 0 : i32
    %c0_i32_1 = arith.constant 0 : i32
    return %c0_i32, %c0_i32_0 : i32, i32
  }
  func.func @transform_2(%arg0: i32) -> (i32, i32) {
    %c0_i32 = arith.constant 0 : i32
    %c0_i32_0 = arith.constant 0 : i32
    %c0_i32_1 = arith.constant 0 : i32
    return %c0_i32, %c0_i32_0 : i32, i32
  }
  func.func @transform_3(%arg0: i32) -> (i32, i32, i32) {
    %c0_i32 = arith.constant 0 : i32
    %c0_i32_0 = arith.constant 0 : i32
    %c0_i32_1 = arith.constant 0 : i32
    %c0_i32_2 = arith.constant 0 : i32
    return %c0_i32, %c0_i32_0, %c0_i32_1 : i32, i32, i32
  }
  func.func @transform_4(%arg0: i32) -> (i32, i32) {
    %c0_i32 = arith.constant 0 : i32
    %c0_i32_0 = arith.constant 0 : i32
    %c0_i32_1 = arith.constant 0 : i32
    return %c0_i32, %c0_i32_0 : i32, i32
  }
  func.func @transform_5(%arg0: i32) -> (i32, i32) {
    %c0_i32 = arith.constant 0 : i32
    %c0_i32_0 = arith.constant 0 : i32
    %c0_i32_1 = arith.constant 0 : i32
    return %c0_i32, %c0_i32_0 : i32, i32
  }
  func.func @transform_6(%arg0: i32) -> (i32, i32, i32) {
    %c0_i32 = arith.constant 0 : i32
    %c0_i32_0 = arith.constant 0 : i32
    %c0_i32_1 = arith.constant 0 : i32
    return %arg0, %c0_i32, %c0_i32_0 : i32, i32, i32
  }
}

</mosaic_0001>

<bundles_post_ra>
// kernel: tpu_custom_call.1
= control target key start
LH: loop header
LB: loop body
LE: loop exit
PB: predicated region body
PF: predicated region fallthrough
CT: control target
= control target key end

     0   :  { %11 = vsyncpa [#allocation3], 0  ;;  %s1838_s0 = inlined_call_operand.vmem [shape: bf16[2,4,256], index: 0, kind: input, shape index: {}]   ;;  %s1839_s1 = inlined_call_operand.vmem [shape: bf16[2,4], index: 1, kind: input, shape index: {}]   ;;  %s1840_s2 = inlined_call_operand.vmem [shape: f32[2,1], index: 2, kind: input, shape index: {}]   ;;  %s1841_s3 = inlined_call_operand.vmem [shape: bf16[4,18,2], index: 3, kind: input, shape index: {}]   ;;  %s1842_s4 = inlined_call_operand.vmem [shape: f32[18,1], index: 4, kind: input, shape index: {}]   ;;  %s1843_s5 = inlined_call_operand.vmem [shape: f32[8,1], index: 5, kind: input, shape index: {}]   ;;  %s1844_s6 = inlined_call_operand.hbm [shape: f32[2,8,256], index: 6, kind: output, shape index: {}]  }
   0x1   :  { %13 = vsyncpa [#allocation3 + $0x1], 0  ;;  %s1411_s21 = smov 0   ;;  %s1413_s22 = smov 0  }
   0x2   :  { %s1415_s23 = smov 0   ;;  %s1417_s24 = smov 0  }
   0x3 LB: > { %s1432_s25 = sadd.s32 4294967295, %s1363_s24   ;;  %s1180_s26 = sadd.s32 4294967294, %s1363_s24   ;;  %s1363_s24 = sphi %s1417_s24, %s1850_s24   ;;  %s1359_s23 = sphi %s1415_s23, %s1849_s23   ;;  %s1355_s22 = sphi %s1413_s22, %s1848_s22   ;;  %s1351_s21 = sphi %s1411_s21, %s1847_s21  }
   0x4   : > { %s1436_s27 = sadd.s32 1, %s1363_s24   ;;  %s157_s28 = sadd.s32 1, %s1359_s23 }
   0x5   : > { %s154_s29 = ssub.s32 %s1363_s24, %s1436_s27  ;;  %p167_p0 = scmp.ne.s32.totalorder %s1359_s23, %s1355_s22 }
   0x6   : > { %p155_p1 = scmp.eq.s32.totalorder %s154_s29, 0  ;;  %p168_p2 = scmp.eq.s32.totalorder %s1432_s25, 1 }
   0x7   : > { %p173_p3 = scmp.ne.s32.totalorder %s1355_s22, %s1351_s21  ;;  %p174_p4 = scmp.eq.s32.totalorder %s1180_s26, 1 }
   0x8   : > { %s1447_s30 = scalar_select %p155_p1, %s1359_s23, %s157_s28  }
   0x9   : > { %p1449_p5 = por %p168_p2, %p167_p0  ;;  %p1453_p6 = por %p174_p4, %p173_p3 }
   0xa   : > { %p1183_p7 = scmp.ge.s32.totalorder %s1363_s24, 1  ;;  %p215_p8 = scmp.lt.s32.totalorder %s1363_s24, 3 }
   0xc   : > { %p216_p9 = pnand %p1183_p7, %p215_p8 }
   0xd   : > { %p245_p10 = scmp.lt.s32.totalorder (!%p216_p9), %s1432_s25, 1  ;;  %s1366_s18 = smov (!%p216_p9), 1  }
   0xe   : > { %219 = sbr.rel (%p216_p9) target bundleno = 1880 (0x758), region = 44  ;;  %s1367_s19 = smov (!%p216_p9), 2  }
   0xf   : > { %s1368_s20 = smov (!%p216_p9), 127   ;;  %s1369_s26 = smov (!%p216_p9), 126  }
  0x10   : > { %s1371_s28 = smov (!%p216_p9), 32   ;;  %s1372_s29 = smov (!%p216_p9), 16  }
  0x11   : > { %s1373_s9 = smov (!%p216_p9), 112   ;;  %s1374_s10 = smov (!%p216_p9), 96  }
  0x13   : > { %v1365_v0 = vmov 0   ;;  %v253_v1 = vld [vmem:[%s1840_s2] sm:$0x3]  ;;  %s246_s11 = scalar_select %p245_p10, %s1432_s25, 1  ;;  %vm272_vm0 = vcmask 1041408   ;;  %vm268_vm1 = vcmask 31744   ;;  %v330_v26 = vlaneseq }
  0x14   : > { %311 = vmatprep.mubr.bf16.mxu0 %v1365_v0  ;;  %1275 = vset.pattern.permute.xlu0 %v1365_v0  ;;  %v252_v5 = vld [vmem:[%s1839_s1] sm:$0x1]  ;;  %vm713_vm2 = vcmask 1040384   ;;  %v1370_v39 = vmov -inf  }
  0x15   : > { %256 = vperm.xlu0 %1275, %v253_v1   ;;  %752 = vmatprep.mubr.bf16.mxu1 %v1365_v0  ;;  %s1224_s12 = sshll.u32 %s246_s11, 2  ;;  %v1502_v27 = vand.u32 127, %v330_v26  ;;  %s1225_s11 = sshll.u32 %s1432_s25, 8 }
  0x16   : > { %1276 = vset.pattern.permute.xlu1 %v1365_v0  ;;  %s249_s15 = scalar_lea.vmem %s1838_s0, %s1224_s12  ;;  %s1375_s25 = smov [#allocation2]  }
  0x17   : > { %v1187_v2 = vld.sshfl [vmem:[%s249_s15] sm:$0x33 pattern:$0x76325410]  ;;  %v1505_v28 = vadd.s32 128, %v1502_v27  ;;  %v337_v29 = vand.u32 15, %v1502_v27 }
  0x18   : > { %v267_v3 = vcombine.high %v1187_v2, %v1187_v2  ;;  %v274_v4 = vsel %vm272_vm0, %v1187_v2, 0  ;;  %vm443_vm7 = vcmp.lt.s32.totalorder %v1502_v27, 2  ;;  %vm454_vm8 = vcmp.lt.s32.totalorder %v1502_v27, 1  ;;  %s1307_s15 = sshll.u32 %s1375_s25, 4  ;;  %s1308_s15 = int_to_ptr.vmem [resolvable:$false] %s1307_s15 }
  0x19   : > { %v344_v30 = vand.u32 15, %v1505_v28  ;;  %v359_v31 = vadd.s32 4294967294, %v337_v29  ;;  %v369_v33 = vadd.s32 4294967295, %v337_v29  ;;  %v379_v37 = vadd.s32 1, %v337_v29  ;;  %s1309_s16 = scalar_lea.vmem %s1308_s15, 512 }
  0x1a   : > { %1188 = vmatprep.subr.msk.bf16.mxu0 %vm272_vm0, %v267_v3  ;;  %v389_v48 = vadd.s32 2, %v337_v29  ;;  %vm465_vm11 = vcmp.lt.s32.totalorder %v1502_v27, 127  ;;  %vm476_vm14 = vcmp.lt.s32.totalorder %v1502_v27, 126  ;;  %vm487_vm0 = vcmp.lt.s32.totalorder %v1502_v27, 32 }
  0x1b   : > { %294 = vmatpush1.bf16.msra.mxu0 %v274_v4  ;;  %v360_v32 = vadd.s32 4294967294, %v344_v30  ;;  %v370_v34 = vadd.s32 4294967295, %v344_v30  ;;  %vm361_vm3 = vcmp.ge.s32.totalorder %v359_v31, 0  ;;  %v380_v38 = vadd.s32 1, %v344_v30 }
  0x1c   : > { %vm371_vm5 = vcmp.ge.s32.totalorder %v369_v33, 0  ;;  %v1511_v40 = vsel %vm361_vm3, 0.0, %v1370_v39  ;;  %vm383_vm9 = vcmp.le.s32.totalorder %v379_v37, 15  ;;  %v390_v49 = vadd.s32 2, %v344_v30 }
  0x1d   : > { %vm362_vm4 = vcmp.ge.s32.totalorder %v360_v32, 0  ;;  %vm372_vm6 = vcmp.ge.s32.totalorder %v370_v34, 0  ;;  %v1518_v43 = vsel %vm371_vm5, 0.0, %v1370_v39  ;;  %vm384_vm10 = vcmp.le.s32.totalorder %v380_v38, 15 }
  0x1e   : > { %1189 = vmatmul.mubr.msk.bf16.vlgmr.msra.gmra.mxu0 %vm268_vm1, %v252_v5  ;;  %v1514_v41 = vsel %vm362_vm4, 0.0, %v1370_v39  ;;  %v1521_v44 = vsel %vm372_vm6, 0.0, %v1370_v39  ;;  %v1537_v57 = vsel %vm383_vm9, 0.0, %v1370_v39  ;;  %v1540_v58 = vsel %vm384_vm10, 0.0, %v1370_v39 }
  0x1f   : > { %823 = vmatprep.mubr.bf16.mxu0 %v1365_v0  ;;  %vm393_vm12 = vcmp.le.s32.totalorder %v389_v48, 15  ;;  %vm394_vm13 = vcmp.le.s32.totalorder %v390_v49, 15  ;;  %vm498_vm3 = vcmp.lt.s32.totalorder %v1502_v27, 16  ;;  %v430_v31 = vadd.s32 32, %v1505_v28 }
  0x20   : > { %vm509_vm5 = vcmp.lt.s32.totalorder %v1502_v27, 112  ;;  %vm520_vm9 = vcmp.lt.s32.totalorder %v1502_v27, 96  ;;  %vm706_vm10 = vcmask 15360  }
  0x21   : > { %vm434_vm6 = vcmp.le.s32.totalorder %v430_v31, 255 }
  0x22   : > { %v1604_v49 = vsel %vm434_vm6, 0.0, %v1370_v39 }
  0x90   : > { %v257_v6 = vpop.permute.xlu0 %256 }
  0xde   : > { %v313_v7 = vpop.f32.mrf.mxu0 }
  0xdf   : > { %v314_v8 = vadd.f32 %v313_v7, %v257_v6  ;;  %v1555_v7 = vsel %vm394_vm13, 0.0, %v1370_v39 }
  0xe0   : > { %v315_v9 = vpop.f32.mrf.mxu0 }
  0xe1   : > { %v320_v10 = vmul.f32 0.5, %v314_v8  ;;  %v316_v11 = vadd.f32 %v315_v9, %v257_v6  ;;  %v1552_v6 = vsel %vm393_vm12, 0.0, %v1370_v39 }
  0xe2   : > { %v317_v12 = vpop.f32.mrf.mxu0 }
  0xe3   : > { %1285 = vtanh.f32 %v320_v10  ;;  %v321_v13 = vmul.f32 0.5, %v316_v11 }
  0xe4   : > { %v318_v14 = vpop.f32.mrf.mxu0 }
  0xe5   : > { %1287 = vtanh.f32 %v321_v13 }
  0xf0   : > { %v1286_v15 = vpop.eup %1285 }
  0xf1   : > { %v324_v16 = vadd.f32 1.0, %v1286_v15 }
  0xf2   : > { %v1288_v17 = vpop.eup %1287 }
  0xf3   : > { %v326_v18 = vmul.f32 0.5, %v324_v16  ;;  %v325_v19 = vadd.f32 1.0, %v1288_v17  ;;  %v399_v17 = vadd.s32 4294967264, %v1502_v27 }
  0xf5   : > { %v1475_v20 = vmul.f32 %v326_v18, %v314_v8  ;;  %v327_v21 = vmul.f32 0.5, %v325_v19  ;;  %vm401_vm15 = vcmp.ge.s32.totalorder %v399_v17, 0  ;;  %v409_v18 = vadd.s32 4294967280, %v1502_v27  ;;  %v1284_v27 = vld [vmem:[%s1841_s3 + $0x2c] ss:$0 sps:$4 sm:$0x11]  }
  0xf6   : > { %v1575_v19 = vsel %vm401_vm15, 0.0, %v1370_v39 }
  0xf7   : > { %v1477_v22 = vmul.f32 %v327_v21, %v316_v11  ;;  %450 = vrot.lane.b32.xlu1 %v1475_v20, %s1366_s18  ;;  %439 = vrot.lane.b32.xlu0 %v1475_v20, %s1367_s19  ;;  %v690_v23 = vpack.c.bf16 %v1475_v20, %v1475_v20  ;;  %vm411_vm1 = vcmp.ge.s32.totalorder %v409_v18, 0 }
  0xf9   : > { %v691_v24 = vpack.c.bf16 %v1477_v22, %v1477_v22  ;;  %v786_v25 = vsel %vm713_vm2, %v690_v23, 0 }
  0xfb   : > { %1200 = vmatprep.subr.msk.bf16.mxu0 %vm713_vm2, %v691_v24  ;;  %441 = vrot.lane.b32.xlu1 %v1477_v22, %s1367_s19 }
  0xfc   : > { %452 = vrot.lane.b32.xlu0 %v1477_v22, %s1366_s18  ;;  %806 = vmatpush1.bf16.msra.mxu0 %v786_v25  ;;  %v1583_v25 = vsel %vm411_vm1, 0.0, %v1370_v39 }
  0xff   : > { %461 = vrot.lane.b32.xlu1 %v1475_v20, %s1368_s20 }
 0x100   : > { %463 = vrot.lane.b32.xlu0 %v1477_v22, %s1368_s20 }
 0x103   : > { %472 = vrot.lane.b32.xlu1 %v1475_v20, %s1369_s26 }
 0x104   : > { %474 = vrot.lane.b32.xlu0 %v1477_v22, %s1369_s26 }
 0x169   : > { %v451_v35 = vpop.permute.xlu1 %450  ;;  %v440_v36 = vpop.permute.xlu0 %439 }
 0x16d   : > { %v442_v42 = vpop.permute.xlu1 %441 }
 0x16e   : > { %v444_v45 = vsel %vm443_vm7, %v440_v36, %v442_v42  ;;  %v445_v46 = vsel %vm443_vm7, %v442_v42, %v440_v36  ;;  %v453_v47 = vpop.permute.xlu0 %452 }
 0x16f   : > { %v446_v50 = vadd.f32 %v445_v46, %v1511_v40  ;;  %v447_v51 = vadd.f32 %v444_v45, %v1514_v41  ;;  %v455_v52 = vsel %vm454_vm8, %v451_v35, %v453_v47  ;;  %v456_v53 = vsel %vm454_vm8, %v453_v47, %v451_v35 }
 0x170   : > { %v457_v59 = vadd.f32 %v456_v53, %v1518_v43  ;;  %v458_v60 = vadd.f32 %v455_v52, %v1521_v44 }
 0x171   : > { %v448_v54 = vmax.f32 %v1475_v20, %v446_v50  ;;  %v449_v55 = vmax.f32 %v1477_v22, %v447_v51  ;;  %v462_v56 = vpop.permute.xlu1 %461  ;;  %v420_v22 = vadd.s32 16, %v1505_v28 }
 0x172   : > { %v464_v61 = vpop.permute.xlu0 %463 }
 0x173   : > { %v466_v62 = vsel %vm465_vm11, %v462_v56, %v464_v61  ;;  %v467_v63 = vsel %vm465_vm11, %v464_v61, %v462_v56  ;;  %v459_v1 = vmax.f32 %v448_v54, %v457_v59  ;;  %v460_v2 = vmax.f32 %v449_v55, %v458_v60 }
 0x174   : > { %v468_v3 = vadd.f32 %v466_v62, %v1537_v57  ;;  %v469_v4 = vadd.f32 %v467_v63, %v1540_v58  ;;  %vm424_vm4 = vcmp.le.s32.totalorder %v420_v22, 255 }
 0x175   : > { %v473_v5 = vpop.permute.xlu1 %472  ;;  %v1593_v36 = vsel %vm424_vm4, 0.0, %v1370_v39 }
 0x176   : > { %v475_v8 = vpop.permute.xlu0 %474  ;;  %v470_v11 = vmax.f32 %v459_v1, %v468_v3  ;;  %v471_v12 = vmax.f32 %v460_v2, %v469_v4 }
 0x177   : > { %v477_v9 = vsel %vm476_vm14, %v473_v5, %v475_v8  ;;  %v478_v10 = vsel %vm476_vm14, %v475_v8, %v473_v5 }
 0x178   : > { %v479_v13 = vadd.f32 %v477_v9, %v1552_v6  ;;  %v480_v14 = vadd.f32 %v478_v10, %v1555_v7 }
 0x17a   : > { %v481_v15 = vmax.f32 %v470_v11, %v479_v13  ;;  %v482_v16 = vmax.f32 %v471_v12, %v480_v14 }
 0x17c   : > { %485 = vrot.lane.b32.xlu0 %v482_v16, %s1371_s28  ;;  %483 = vrot.lane.b32.xlu1 %v481_v15, %s1371_s28 }
 0x180   : > { %496 = vrot.lane.b32.xlu0 %v482_v16, %s1372_s29  ;;  %494 = vrot.lane.b32.xlu1 %v481_v15, %s1372_s29 }
 0x184   : > { %507 = vrot.lane.b32.xlu0 %v482_v16, %s1373_s9  ;;  %505 = vrot.lane.b32.xlu1 %v481_v15, %s1373_s9 }
 0x188   : > { %518 = vrot.lane.b32.xlu0 %v482_v16, %s1374_s10  ;;  %516 = vrot.lane.b32.xlu1 %v481_v15, %s1374_s10 }
 0x1ee   : > { %v486_v20 = vpop.permute.xlu0 %485  ;;  %v484_v21 = vpop.permute.xlu1 %483 }
 0x1ef   : > { %v489_v23 = vsel %vm487_vm0, %v486_v20, %v484_v21  ;;  %v488_v35 = vsel %vm487_vm0, %v484_v21, %v486_v20 }
 0x1f0   : > { %v490_v24 = vadd.f32 %v489_v23, %v1575_v19  ;;  %v493_v47 = vmax.f32 %v482_v16, %v488_v35 }
 0x1f2   : > { %v497_v29 = vpop.permute.xlu0 %496  ;;  %v495_v30 = vpop.permute.xlu1 %494  ;;  %v492_v33 = vmax.f32 %v481_v15, %v490_v24 }
 0x1f3   : > { %v500_v32 = vsel %vm498_vm3, %v497_v29, %v495_v30  ;;  %v499_v28 = vsel %vm498_vm3, %v495_v30, %v497_v29 }
 0x1f4   : > { %v501_v34 = vadd.f32 %v500_v32, %v1583_v25  ;;  %v504_v50 = vmax.f32 %v493_v47, %v499_v28 }
 0x1f6   : > { %v508_v37 = vpop.permute.xlu0 %507  ;;  %v503_v38 = vmax.f32 %v492_v33, %v501_v34  ;;  %v506_v42 = vpop.permute.xlu1 %505 }
 0x1f7   : > { %v510_v45 = vsel %vm509_vm5, %v506_v42, %v508_v37  ;;  %v511_v46 = vsel %vm509_vm5, %v508_v37, %v506_v42 }
 0x1f8   : > { %v513_v48 = vadd.f32 %v511_v46, %v1593_v36  ;;  %v514_v51 = vmax.f32 %v503_v38, %v510_v45  ;;  %v1277_v45 = vld [vmem:[%s1841_s3 + $0xc] sm:$0xff]  }
 0x1fa   : > { %v519_v52 = vpop.permute.xlu0 %518  ;;  %v517_v53 = vpop.permute.xlu1 %516  ;;  %v515_v56 = vmax.f32 %v504_v50, %v513_v48 }
 0x1fb   : > { %v521_v54 = vsel %vm520_vm9, %v517_v53, %v519_v52  ;;  %v522_v55 = vsel %vm520_vm9, %v519_v52, %v517_v53 }
 0x1fc   : > { %v524_v59 = vadd.f32 %v522_v55, %v1604_v49  ;;  %v525_v60 = vmax.f32 %v514_v51, %v521_v54 }
 0x1fe   : > { %v526_v61 = vmax.f32 %v515_v56, %v524_v59  ;;  %527 = vrot.lane.b32.xlu1 %v525_v60, %s1367_s19  ;;  %v696_v62 = vpack.c.bf16 %v525_v60, %v525_v60 }
 0x200   : > { %529 = vrot.lane.b32.xlu0 %v526_v61, %s1367_s19  ;;  %v697_v39 = vpack.c.bf16 %v526_v61, %v526_v61  ;;  %v715_v63 = vsel %vm713_vm2, %v696_v62, 0 }
 0x202   : > { %1195 = vmatprep.subr.msk.bf16.mxu1 %vm713_vm2, %v697_v39  ;;  %537 = vrot.lane.b32.xlu1 %v525_v60, %s1366_s18 }
 0x203   : > { %735 = vmatpush1.bf16.msra.mxu1 %v715_v63 }
 0x204   : > { %539 = vrot.lane.b32.xlu0 %v526_v61, %s1366_s18 }
 0x206   : > { %547 = vrot.lane.b32.xlu1 %v525_v60, %s1368_s20  ;;  %1196 = vmatmul.mubr.msk.bf16.vlgmr.msra.gmra.mxu1 %vm706_vm10, %v1277_v45 }
 0x207   : > { %762 = vmatprep.mubr.bf16.mxu1 %v1365_v0 }
 0x208   : > { %549 = vrot.lane.b32.xlu0 %v526_v61, %s1368_s20 }
 0x20a   : > { %557 = vrot.lane.b32.xlu1 %v525_v60, %s1369_s26 }
 0x20c   : > { %559 = vrot.lane.b32.xlu0 %v526_v61, %s1369_s26 }
 0x270   : > { %v528_v1 = vpop.permute.xlu1 %527 }
 0x272   : > { %v530_v2 = vpop.permute.xlu0 %529 }
 0x273   : > { %v531_v4 = vsel %vm443_vm7, %v528_v1, %v530_v2  ;;  %v532_v5 = vsel %vm443_vm7, %v530_v2, %v528_v1 }
 0x274   : > { %v538_v3 = vpop.permute.xlu1 %537  ;;  %v533_v11 = vadd.f32 %v532_v5, %v1511_v40  ;;  %v534_v12 = vadd.f32 %v531_v4, %v1514_v41 }
 0x276   : > { %v540_v8 = vpop.permute.xlu0 %539  ;;  %v535_v20 = vmax.f32 %v525_v60, %v533_v11  ;;  %v536_v21 = vmax.f32 %v526_v61, %v534_v12 }
 0x277   : > { %v541_v9 = vsel %vm454_vm8, %v538_v3, %v540_v8  ;;  %v542_v10 = vsel %vm454_vm8, %v540_v8, %v538_v3 }
 0x278   : > { %v548_v13 = vpop.permute.xlu1 %547  ;;  %v543_v14 = vadd.f32 %v542_v10, %v1518_v43  ;;  %v544_v15 = vadd.f32 %v541_v9, %v1521_v44 }
 0x27a   : > { %v550_v16 = vpop.permute.xlu0 %549  ;;  %v545_v24 = vmax.f32 %v535_v20, %v543_v14  ;;  %v546_v29 = vmax.f32 %v536_v21, %v544_v15 }
 0x27b   : > { %v551_v17 = vsel %vm465_vm11, %v548_v13, %v550_v16  ;;  %v552_v18 = vsel %vm465_vm11, %v550_v16, %v548_v13 }
 0x27c   : > { %v553_v22 = vadd.f32 %v551_v17, %v1537_v57  ;;  %v554_v23 = vadd.f32 %v552_v18, %v1540_v58  ;;  %v558_v30 = vpop.permute.xlu1 %557  ;;  %v1278_v18 = vld [vmem:[%s1841_s3 + $0x14] ss:$0 sps:$4 sm:$0x11]  }
 0x27d   : > { %1197 = vmatmul.mubr.msk.bf16.gmra.mxu1 %vm706_vm10, %v1278_v18 }
 0x27e   : > { %v560_v31 = vpop.permute.xlu0 %559  ;;  %v555_v34 = vmax.f32 %v545_v24, %v553_v22  ;;  %v556_v35 = vmax.f32 %v546_v29, %v554_v23  ;;  %900 = vmatprep.mubr.bf16.mxu1 %v1365_v0  ;;  %v1279_v23 = vld [vmem:[%s1841_s3] sm:$0xff]  }
 0x27f   : > { %v561_v32 = vsel %vm476_vm14, %v558_v30, %v560_v31  ;;  %v562_v33 = vsel %vm476_vm14, %v560_v31, %v558_v30  ;;  %1201 = vmatmul.mubr.msk.bf16.vlgmr.msra.gmra.mxu0 %vm706_vm10, %v1279_v23  ;;  %v1280_v31 = vld [vmem:[%s1841_s3 + $0x18] sm:$0xff]  }
 0x280   : > { %v563_v37 = vadd.f32 %v561_v32, %v1552_v6  ;;  %v564_v38 = vadd.f32 %v562_v33, %v1555_v7  ;;  %833 = vmatprep.mubr.bf16.mxu0 %v1365_v0 }
 0x282   : > { %v565_v42 = vmax.f32 %v555_v34, %v563_v37  ;;  %v566_v28 = vmax.f32 %v556_v35, %v564_v38 }
 0x284   : > { %569 = vrot.lane.b32.xlu0 %v566_v28, %s1371_s28  ;;  %567 = vrot.lane.b32.xlu1 %v565_v42, %s1371_s28 }
 0x288   : > { %579 = vrot.lane.b32.xlu0 %v566_v28, %s1372_s29  ;;  %577 = vrot.lane.b32.xlu1 %v565_v42, %s1372_s29 }
 0x28c   : > { %589 = vrot.lane.b32.xlu0 %v566_v28, %s1373_s9  ;;  %587 = vrot.lane.b32.xlu1 %v565_v42, %s1373_s9 }
 0x290   : > { %599 = vrot.lane.b32.xlu0 %v566_v28, %s1374_s10  ;;  %597 = vrot.lane.b32.xlu1 %v565_v42, %s1374_s10 }
 0x2f6   : > { %v570_v46 = vpop.permute.xlu0 %569  ;;  %v568_v47 = vpop.permute.xlu1 %567 }
 0x2f7   : > { %v572_v48 = vsel %vm487_vm0, %v570_v46, %v568_v47  ;;  %v571_v56 = vsel %vm487_vm0, %v568_v47, %v570_v46 }
 0x2f8   : > { %v573_v50 = vadd.f32 %v572_v48, %v1575_v19  ;;  %v576_v1 = vmax.f32 %v566_v28, %v571_v56 }
 0x2fa   : > { %v580_v51 = vpop.permute.xlu0 %579  ;;  %v578_v52 = vpop.permute.xlu1 %577  ;;  %v575_v54 = vmax.f32 %v565_v42, %v573_v50 }
 0x2fb   : > { %v582_v53 = vsel %vm498_vm3, %v580_v51, %v578_v52  ;;  %v581_v62 = vsel %vm498_vm3, %v578_v52, %v580_v51 }
 0x2fc   : > { %v583_v55 = vadd.f32 %v582_v53, %v1583_v25  ;;  %v586_v3 = vmax.f32 %v576_v1, %v581_v62 }
 0x2fe   : > { %v590_v59 = vpop.permute.xlu0 %589  ;;  %v585_v60 = vmax.f32 %v575_v54, %v583_v55  ;;  %v588_v61 = vpop.permute.xlu1 %587 }
 0x2ff   : > { %v591_v39 = vsel %vm509_vm5, %v588_v61, %v590_v59  ;;  %v592_v63 = vsel %vm509_vm5, %v590_v59, %v588_v61  ;;  %v1283_v61 = vld [vmem:[%s1841_s3 + $0x20] ss:$0 sps:$4 sm:$0x11]  }
 0x300   : > { %v594_v2 = vadd.f32 %v592_v63, %v1593_v36  ;;  %v595_v4 = vmax.f32 %v585_v60, %v591_v39 }
 0x302   : > { %v600_v5 = vpop.permute.xlu0 %599  ;;  %v598_v8 = vpop.permute.xlu1 %597  ;;  %v596_v11 = vmax.f32 %v586_v3, %v594_v2 }
 0x303   : > { %v601_v9 = vsel %vm520_vm9, %v598_v8, %v600_v5  ;;  %v602_v10 = vsel %vm520_vm9, %v600_v5, %v598_v8 }
 0x304   : > { %v604_v12 = vadd.f32 %v602_v10, %v1604_v49  ;;  %v605_v13 = vmax.f32 %v595_v4, %v601_v9 }
 0x306   : > { %v606_v14 = vmax.f32 %v596_v11, %v604_v12  ;;  %607 = vrot.lane.b32.xlu1 %v605_v13, %s1367_s19  ;;  %v846_v15 = vpack.c.bf16 %v605_v13, %v605_v13 }
 0x308   : > { %609 = vrot.lane.b32.xlu0 %v606_v14, %s1367_s19  ;;  %v847_v16 = vpack.c.bf16 %v606_v14, %v606_v14  ;;  %v863_v17 = vsel %vm713_vm2, %v846_v15, 0 }
 0x30a   : > { %617 = vrot.lane.b32.xlu1 %v605_v13, %s1366_s18  ;;  %1208 = vmatprep.subr.msk.bf16.mxu1 %vm713_vm2, %v847_v16 }
 0x30b   : > { %883 = vmatpush1.bf16.msra.mxu1 %v863_v17 }
 0x30c   : > { %619 = vrot.lane.b32.xlu0 %v606_v14, %s1366_s18 }
 0x30e   : > { %627 = vrot.lane.b32.xlu1 %v605_v13, %s1368_s20  ;;  %1209 = vmatmul.mubr.msk.bf16.vlgmr.msra.gmra.mxu1 %vm706_vm10, %v1280_v31 }
 0x30f   : > { %910 = vmatprep.mubr.bf16.mxu1 %v1365_v0 }
 0x310   : > { %629 = vrot.lane.b32.xlu0 %v606_v14, %s1368_s20  ;;  %s242_s20 = sand.u32 1, %s1355_s22  }
 0x312   : > { %637 = vrot.lane.b32.xlu1 %v605_v13, %s1369_s26 }
 0x314   : > { %639 = vrot.lane.b32.xlu0 %v606_v14, %s1369_s26  ;;  %s1184_s26 = sshll.u32 %s242_s20, 4 }
 0x315   : > { %s244_s12 = scalar_lea.vmem [#allocation2], %s1184_s26 }
 0x316   : > { %1210 = vmatmul.mubr.msk.bf16.gmra.mxu1 %vm706_vm10, %v1283_v61  ;;  %s1121_s13 = sshll.u32 %s244_s12, 4  ;;  %s1122_s13 = int_to_ptr.vmem [resolvable:$true] %s1121_s13 }
 0x317   : > { %s1303_s14 = scalar_lea.vmem %s1122_s13, 256  ;;  %p1310_p0 = scmp.lt.s32.totalorder %s1122_s13, %s1308_s15 }
 0x318   : > { %p1304_p11 = scmp.ne.s32.totalorder %s1122_s13, %s1303_s14  ;;  %p1311_p1 = scmp.lt.s32.totalorder %s1309_s16, %s1303_s14 }
 0x31a   : > { %p1305_p12 = pnand %p1304_p11, %p1449_p5  ;;  %p1312_p2 = por %p1311_p1, %p1310_p0 }
 0x31c   : > { %p1306_p13 = pneg %p1305_p12 }
 0x31e   : > { %p1313_p3 = pnand %p1312_p2, %p1306_p13 }
 0x378   : > { %v608_v20 = vpop.permute.xlu1 %607 }
 0x37a   : > { %v610_v21 = vpop.permute.xlu0 %609 }
 0x37b   : > { %v611_v24 = vsel %vm443_vm7, %v608_v20, %v610_v21  ;;  %v612_v29 = vsel %vm443_vm7, %v610_v21, %v608_v20 }
 0x37c   : > { %v618_v22 = vpop.permute.xlu1 %617  ;;  %v613_v34 = vadd.f32 %v612_v29, %v1511_v40  ;;  %v614_v35 = vadd.f32 %v611_v24, %v1514_v41 }
 0x37e   : > { %v620_v30 = vpop.permute.xlu0 %619  ;;  %v615_v47 = vmax.f32 %v605_v13, %v613_v34  ;;  %v616_v40 = vmax.f32 %v606_v14, %v614_v35 }
 0x37f   : > { %v621_v32 = vsel %vm454_vm8, %v618_v22, %v620_v30  ;;  %v622_v33 = vsel %vm454_vm8, %v620_v30, %v618_v22 }
 0x380   : > { %v628_v37 = vpop.permute.xlu1 %627  ;;  %v623_v38 = vadd.f32 %v622_v33, %v1518_v43  ;;  %v624_v42 = vadd.f32 %v621_v32, %v1521_v44  ;;  %v1281_v43 = vld [vmem:[%s1841_s3 + $0x8] ss:$0 sps:$4 sm:$0x11]  }
 0x381   : > { %1202 = vmatmul.mubr.msk.bf16.gmra.mxu0 %vm706_vm10, %v1281_v43  ;;  %v1282_v32 = vld [vmem:[%s1841_s3 + $0x24] sm:$0xff]  }
 0x382   : > { %v630_v28 = vpop.permute.xlu0 %629  ;;  %v625_v50 = vmax.f32 %v615_v47, %v623_v38  ;;  %v626_v51 = vmax.f32 %v616_v40, %v624_v42  ;;  %983 = vmatprep.mubr.bf16.mxu0 %v1365_v0 }
 0x383   : > { %v631_v45 = vsel %vm465_vm11, %v628_v37, %v630_v28  ;;  %v632_v46 = vsel %vm465_vm11, %v630_v28, %v628_v37  ;;  %v825_v28 = vpop.f32.mrf.mxu0 }
 0x384   : > { %v633_v41 = vadd.f32 %v631_v45, %v1537_v57  ;;  %v634_v48 = vadd.f32 %v632_v46, %v1540_v58  ;;  %v638_v52 = vpop.permute.xlu1 %637 }
 0x385   : > { %v827_v47 = vpop.f32.mrf.mxu0 }
 0x386   : > { %v640_v53 = vpop.permute.xlu0 %639  ;;  %v635_v55 = vmax.f32 %v625_v50, %v633_v41  ;;  %v636_v56 = vmax.f32 %v626_v51, %v634_v48 }
 0x387   : > { %v641_v44 = vsel %vm476_vm14, %v638_v52, %v640_v53  ;;  %v642_v54 = vsel %vm476_vm14, %v640_v53, %v638_v52  ;;  %v829_v48 = vpop.f32.mrf.mxu0 }
 0x388   : > { %v643_v57 = vadd.f32 %v641_v44, %v1552_v6  ;;  %v644_v58 = vadd.f32 %v642_v54, %v1555_v7  ;;  %v1010_v6 = vld [vmem:[%s1842_s4 + $0x10] sm:$0x3] }
 0x389   : > { %v831_v53 = vpop.f32.mrf.mxu0 }
 0x38a   : > { %v645_v59 = vmax.f32 %v635_v55, %v643_v57  ;;  %v646_v60 = vmax.f32 %v636_v56, %v644_v58 }
 0x38c   : > { %649 = vrot.lane.b32.xlu0 %v646_v60, %s1371_s28  ;;  %647 = vrot.lane.b32.xlu1 %v645_v59, %s1371_s28 }
 0x390   : > { %659 = vrot.lane.b32.xlu0 %v646_v60, %s1372_s29  ;;  %657 = vrot.lane.b32.xlu1 %v645_v59, %s1372_s29 }
 0x394   : > { %669 = vrot.lane.b32.xlu0 %v646_v60, %s1373_s9  ;;  %667 = vrot.lane.b32.xlu1 %v645_v59, %s1373_s9  ;;  %s1803_s9 = scalar_lea.hbm %s1844_s6, %s1225_s11 }
 0x398   : > { %679 = vrot.lane.b32.xlu0 %v646_v60, %s1374_s10  ;;  %677 = vrot.lane.b32.xlu1 %v645_v59, %s1374_s10  ;;  %s1107_s10 = scalar_lea.sflag [#allocation3], %s242_s20 }
 0x39c   : > { %1023 = vperm.xlu1 %1276, %v1010_v6  }
 0x3fe   : > { %v650_v7 = vpop.permute.xlu0 %649  ;;  %v648_v62 = vpop.permute.xlu1 %647 }
 0x3ff   : > { %v652_v39 = vsel %vm487_vm0, %v650_v7, %v648_v62  ;;  %v651_v8 = vsel %vm487_vm0, %v648_v62, %v650_v7 }
 0x400   : > { %v653_v63 = vadd.f32 %v652_v39, %v1575_v19  ;;  %v656_v14 = vmax.f32 %v646_v60, %v651_v8 }
 0x402   : > { %v660_v1 = vpop.permute.xlu0 %659  ;;  %v658_v2 = vpop.permute.xlu1 %657  ;;  %v655_v4 = vmax.f32 %v645_v59, %v653_v63 }
 0x403   : > { %v662_v3 = vsel %vm498_vm3, %v660_v1, %v658_v2  ;;  %v661_v12 = vsel %vm498_vm3, %v658_v2, %v660_v1 }
 0x404   : > { %v663_v5 = vadd.f32 %v662_v3, %v1583_v25  ;;  %v666_v16 = vmax.f32 %v656_v14, %v661_v12 }
 0x406   : > { %v670_v9 = vpop.permute.xlu0 %669  ;;  %v665_v10 = vmax.f32 %v655_v4, %v663_v5  ;;  %v668_v11 = vpop.permute.xlu1 %667 }
 0x407   : > { %v671_v19 = vsel %vm509_vm5, %v668_v11, %v670_v9  ;;  %v672_v13 = vsel %vm509_vm5, %v670_v9, %v668_v11 }
 0x408   : > { %v674_v15 = vadd.f32 %v672_v13, %v1593_v36  ;;  %v675_v25 = vmax.f32 %v665_v10, %v671_v19 }
 0x40a   : > { %v680_v17 = vpop.permute.xlu0 %679  ;;  %v678_v18 = vpop.permute.xlu1 %677  ;;  %v676_v22 = vmax.f32 %v666_v16, %v674_v15 }
 0x40b   : > { %v681_v20 = vsel %vm520_vm9, %v678_v18, %v680_v17  ;;  %v682_v21 = vsel %vm520_vm9, %v680_v17, %v678_v18 }
 0x40c   : > { %v684_v23 = vadd.f32 %v682_v21, %v1604_v49  ;;  %v685_v24 = vmax.f32 %v675_v25, %v681_v20  ;;  %v754_v49 = vpop.f32.mrf.mxu1 }
 0x40d   : > { %v826_v46 = vadd.f32 %v825_v28, %v754_v49 }
 0x40e   : > { %v686_v29 = vmax.f32 %v676_v22, %v684_v23  ;;  %v929_v30 = vpack.c.bf16 %v685_v24, %v685_v24  ;;  %v756_v33 = vpop.f32.mrf.mxu1  ;;  %v1008_v24 = vld [vmem:[%s1842_s4] sm:$0xff] }
 0x40f   : > { %v828_v41 = vadd.f32 %v827_v47, %v756_v33 }
 0x410   : > { %v930_v31 = vpack.c.bf16 %v686_v29, %v686_v29  ;;  %v946_v36 = vsel %vm713_vm2, %v929_v30, 0  ;;  %v758_v34 = vpop.f32.mrf.mxu1 }
 0x411   : > { %v830_v51 = vadd.f32 %v829_v48, %v758_v34 }
 0x412   : > { %1216 = vmatprep.subr.msk.bf16.mxu0 %vm713_vm2, %v930_v31  ;;  %v760_v35 = vpop.f32.mrf.mxu1  ;;  %vm1042_vm2 = vcmask 1041409  }
 0x413   : > { %966 = vmatpush1.bf16.msra.mxu0 %v946_v36  ;;  %v832_v44 = vadd.f32 %v831_v53, %v760_v35  ;;  %v1009_v53 = vld [vmem:[%s1842_s4 + $0x8] sm:$0xff] }
 0x414   : > { %v764_v37 = vpop.f32.mrf.mxu1 }
 0x416   : > { %1217 = vmatmul.mubr.msk.bf16.vlgmr.msra.gmra.mxu0 %vm706_vm10, %v1282_v32  ;;  %v766_v38 = vpop.f32.mrf.mxu1 }
 0x417   : > { %993 = vmatprep.mubr.bf16.mxu0 %v1365_v0  ;;  %v1024_v13 = vpop.permute.xlu1 %1023 }
 0x418   : > { %v768_v42 = vpop.f32.mrf.mxu1 }
 0x41a   : > { %v769_v45 = vpop.f32.mrf.mxu1 }
 0x41c   : > { %v902_v40 = vpop.f32.mrf.mxu1 }
 0x41d   : > { %v919_v0 = vadd.f32 %v902_v40, %v826_v46 }
 0x41e   : > { %1218 = vmatmul.mubr.msk.bf16.gmra.mxu0 %vm706_vm10, %v1284_v27  ;;  %v904_v50 = vpop.f32.mrf.mxu1 }
 0x41f   : > { %v920_v52 = vadd.f32 %v904_v50, %v828_v41 }
 0x420   : > { %v906_v43 = vpop.f32.mrf.mxu1 }
 0x421   : > { %v921_v54 = vadd.f32 %v906_v43, %v830_v51 }
 0x422   : > { %v908_v55 = vpop.f32.mrf.mxu1 }
 0x423   : > { %v922_v56 = vadd.f32 %v908_v55, %v832_v44 }
 0x424   : > { %v912_v6 = vpop.f32.mrf.mxu1 }
 0x426   : > { %v914_v39 = vpop.f32.mrf.mxu1 }
 0x428   : > { %v916_v1 = vpop.f32.mrf.mxu1 }
 0x42a   : > { %v917_v2 = vpop.f32.mrf.mxu1 }
 0x441   : > { %v835_v57 = vpop.f32.mrf.mxu0 }
 0x442   : > { %v836_v58 = vadd.f32 %v835_v57, %v764_v37 }
 0x443   : > { %v837_v59 = vpop.f32.mrf.mxu0 }
 0x444   : > { %v838_v60 = vadd.f32 %v837_v59, %v766_v38  ;;  %v923_v62 = vadd.f32 %v912_v6, %v836_v58  ;;  %v1063_v38 = vshrl.u32 %v330_v26, 7  ;;  %v1075_v26 = vld [vmem:[%s1843_s5] sm:$0xff] }
 0x445   : > { %v839_v61 = vpop.f32.mrf.mxu0 }
 0x446   : > { %v924_v63 = vadd.f32 %v914_v39, %v838_v60  ;;  %v1064_v42 = vsub.s32 1, %v1063_v38  ;;  %v1084_v6 = vsub.s32 0, %v1063_v38 }
 0x447   : > { %v840_v7 = vpop.f32.mrf.mxu0 }
 0x4d6   : > { %v985_v3 = vpop.f32.mrf.mxu0 }
 0x4d7   : > { %v1002_v4 = vadd.f32 %v985_v3, %v919_v0 }
 0x4d8   : > { %v987_v5 = vpop.f32.mrf.mxu0 }
 0x4d9   : > { %v1003_v8 = vadd.f32 %v987_v5, %v920_v52 }
 0x4da   : > { %v989_v9 = vpop.f32.mrf.mxu0 }
 0x4db   : > { %v1778_v10 = vadd.f32 %v989_v9, %v921_v54 }
 0x4dc   : > { %v991_v11 = vpop.f32.mrf.mxu0 }
 0x4dd   : > { %v1780_v12 = vadd.f32 %v991_v11, %v922_v56 }
 0x4de   : > { %v995_v19 = vpop.f32.mrf.mxu0 }
 0x4df   : > { %v1006_v14 = vadd.f32 %v995_v19, %v923_v62 }
 0x4e0   : > { %v997_v15 = vpop.f32.mrf.mxu0 }
 0x4e1   : > { %v1030_v16 = vadd.f32 %v1024_v13, %v1006_v14  ;;  %v1007_v25 = vadd.f32 %v997_v15, %v924_v63 }
 0x4e2   : > { %v999_v17 = vpop.f32.mrf.mxu0 }
 0x4e3   : > { %v1031_v18 = vadd.f32 %v1024_v13, %v1007_v25  ;;  %v1043_v21 = vsel %vm1042_vm2, %v1030_v16, -inf  ;;  %v1032_v54 = vmul.f32 0.5, %v1030_v16 }
 0x4e4   : > { %v1000_v20 = vpop.f32.mrf.mxu0 }
 0x4e5   : > { %v1044_v22 = vsel %vm1042_vm2, %v1031_v18, -inf  ;;  %v1033_v55 = vmul.f32 0.5, %v1031_v18 }
 0x4e6   : > { %v1045_v23 = vmax.f32 %v1043_v21, %v1044_v22 }
 0x4e8   : > { %1046 = vmax.xlane.f32.xlu0 %v1045_v23 }
 0x4fe   : > { %1013 = vperm.xlu0 %1275, %v1008_v24  }
 0x571   : > { %v1047_v29 = vpop.xlane.xlu0 %1046 }
 0x572   : > { %v1048_v30 = vsub.f32 %v1030_v16, %v1047_v29  ;;  %v1049_v31 = vsub.f32 %v1031_v18, %v1047_v29 }
 0x574   : > { %v1050_v36 = vmul.f32 1.442695, %v1048_v30  ;;  %v1052_v32 = vmul.f32 1.442695, %v1049_v31 }
 0x576   : > { %1289 = vpow2.f32 %v1050_v36 }
 0x577   : > { %1291 = vpow2.f32 %v1052_v32 }
 0x579   : > { %v1014_v45 = vpop.permute.xlu0 %1013 }
 0x57a   : > { %v1026_v40 = vadd.f32 %v1014_v45, %v1002_v4  ;;  %v1027_v41 = vadd.f32 %v1014_v45, %v1003_v8 }
 0x583   : > { %v1290_v27 = vpop.eup %1289 }
 0x584   : > { %v1292_v49 = vpop.eup %1291  ;;  %v1054_v33 = vsel %vm1042_vm2, %v1290_v27, 0.0 }
 0x585   : > { %v1055_v34 = vsel %vm1042_vm2, %v1292_v49, 0.0 }
 0x586   : > { %v1056_v35 = vadd.f32 %v1055_v34, %v1054_v33 }
 0x588   : > { %1057 = vadd.xlane.f32.xlu1 %v1056_v35 }
 0x611   : > { %v1058_v37 = vpop.xlane.xlu1 %1057 }
 0x612   : > { %1293 = vrcp.f32 %v1058_v37 }
 0x613   : > { %1295 = vtanh.f32 %v1032_v54 }
 0x614   : > { %1297 = vtanh.f32 %v1033_v55 }
 0x61f   : > { %v1294_v28 = vpop.eup %1293 }
 0x620   : > { %v1060_v46 = vmul.f32 %v1294_v28, %v1290_v27  ;;  %v1061_v47 = vmul.f32 %v1294_v28, %v1292_v49  ;;  %v1296_v56 = vpop.eup %1295 }
 0x621   : > { %v1298_v57 = vpop.eup %1297  ;;  %v1036_v58 = vadd.f32 1.0, %v1296_v56 }
 0x622   : > { %v1065_v0 = vrot.slane %v1060_v46, %v1064_v42  ;;  %v1069_v48 = vrot.slane %v1061_v47, %v1064_v42  ;;  %v1037_v59 = vadd.f32 1.0, %v1298_v57 }
 0x623   : > { %v1038_v60 = vmul.f32 0.5, %v1036_v58 }
 0x624   : > { %v1070_v50 = vmul.f32 %v1065_v0, %v1026_v40  ;;  %v1071_v51 = vmul.f32 %v1069_v48, %v1027_v41  ;;  %v1039_v61 = vmul.f32 0.5, %v1037_v59 }
 0x625   : > { %v1085_v62 = vrot.slane %v1038_v60, %v1084_v6 }
 0x626   : > { %v1072_v52 = vadd.f32 %v1071_v51, %v1070_v50  ;;  %v1089_v39 = vrot.slane %v1039_v61, %v1084_v6 }
 0x628   : > { %1073 = vadd.xlane.f32.xlu1 %v1072_v52 }
 0x639   : > { %1018 = vperm.xlu1 %1276, %v1009_v53  }
 0x6b1   : > { %v1074_v43 = vpop.xlane.xlu1 %1073 }
 0x6b2   : > { %v1076_v44 = vadd.f32 %v1075_v26, %v1074_v43 }
 0x6b4   : > { %1079 = vperm.xlu0 %1275, %v1076_v44  }
 0x6b5   : > { %v1019_v7 = vpop.permute.xlu1 %1018 }
 0x6b6   : > { %v1028_v1 = vadd.f32 %v1019_v7, %v1778_v10  ;;  %v1029_v2 = vadd.f32 %v1019_v7, %v1780_v12 }
 0x72f   : > { %v1080_v63 = vpop.permute.xlu0 %1079 }
 0x730   : > { %v1090_v3 = vmul.f32 %v1085_v62, %v1080_v63  ;;  %v1091_v4 = vmul.f32 %v1089_v39, %v1080_v63 }
 0x732   : > { %v1092_v5 = vadd.f32 %v1090_v3, %v1028_v1  ;;  %v1093_v8 = vadd.f32 %v1091_v4, %v1029_v2 }
 0x734   : > { %v1094_v9 = vmul.f32 0.5, %v1092_v5  ;;  %v1095_v11 = vmul.f32 0.5, %v1093_v8 }
 0x736   : > { %1299 = vtanh.f32 %v1094_v9 }
 0x737   : > { %1301 = vtanh.f32 %v1095_v11 }
 0x743   : > { %v1300_v19 = vpop.eup %1299 }
 0x744   : > { %v1302_v13 = vpop.eup %1301  ;;  %v1098_v14 = vadd.f32 1.0, %v1300_v19 }
 0x745   : > { %v1099_v15 = vadd.f32 1.0, %v1302_v13 }
 0x746   : > { %v1100_v16 = vmul.f32 0.5, %v1098_v14 }
 0x747   : > { %v1101_v10 = vmul.f32 0.5, %v1099_v15 }
 0x748   : > { %v1102_v12 = vmul.f32 %v1100_v16, %v1092_v5 }
 0x749   : > { %v1103_v25 = vmul.f32 %v1101_v10, %v1093_v8 }
 0x74a   : > { %1104 = vst [vmem:[%s244_s12] sm:$0xff] %v1102_v12 }
 0x74b   : > { %1105 = vst [vmem:[%s244_s12 + $0x8] sm:$0xff] %v1103_v25 }
 0x74c   : > { %1316 = shalt.err (!%p1313_p3)
}
 0x74d   : > { %s1317_s17 = scalar_lea.hbm %s1803_s9, 256  ;;  %s1321_s20 = scalar_lea.hbm %s1844_s6, 512 }
 0x74e   : > { %p1318_p4 = scmp.ne.s32.totalorder %s1803_s9, %s1317_s17  ;;  %p1322_p9 = scmp.lt.s32.totalorder %s1803_s9, %s1844_s6 }
 0x74f   : > { %p1323_p10 = scmp.lt.s32.totalorder %s1321_s20, %s1317_s17 }
 0x750   : > { %p1319_p7 = pnand %p1318_p4, %p1449_p5 }
 0x751   : > { %p1324_p11 = por %p1323_p10, %p1322_p9 }
 0x752   : > { %p1320_p8 = pneg %p1319_p7 }
 0x754   : > { %p1325_p12 = pnand %p1324_p11, %p1320_p8 }
 0x756   : > { %1328 = shalt.err (!%p1325_p12)
}
 0x757   : > { %1226 = dma.vmem_to_hbm [thread:$0]  (%p1449_p5), %s1122_s13, 256, %s1803_s9, %s1107_s10  }
 0x758 PF: > { %p1232_p13 = scmp.ge.s32.totalorder %s1363_s24, 2  ;;  %s1133_s12 = sand.u32 1, %s1351_s21  }
 0x759   : > { %s1134_s28 = scalar_lea.sflag [#allocation3], %s1133_s12 }
 0x75a   : > { %p1229_p0 = pnand %p1232_p13, %p1453_p6 }
 0x75c   : > { %p1230_p1 = pneg %p1229_p0 }
 0x75e   : > { %1346 = dma.done.wait (%p1230_p1), %s1134_s28, 256  }
 0x75f   : > { %1348 = vsyncadd (%p1230_p1), %s1134_s28, 4294967040  ;;  %p16_p2 = scmp.ge.s32.totalorder %s1436_s27, 4   ;;  %s1847_s21 = smov %s1355_s22 }
 0x760   : > { %s1848_s22 = smov %s1359_s23  ;;  %s1849_s23 = smov %s1447_s30 }
 0x761   : > { %s1850_s24 = smov %s1436_s27  ;;  %18 = sbr.rel (!%p16_p2) target bundleno = 3 (0x3), region = 82 }
 0x766   :  { %1139 = vsyncpa [#allocation3], 1 }
 0x767   :  { %1141 = vsyncpa [#allocation3 + $0x1], 1 }

// kernel: tpu_custom_call.1
= control target key start
LH: loop header
LB: loop body
LE: loop exit
PB: predicated region body
PF: predicated region fallthrough
CT: control target
= control target key end

     0   :  { %11 = vsyncpa [#allocation3], 0  ;;  %s1838_s0 = inlined_call_operand.vmem [shape: bf16[2,4,256], index: 0, kind: input, shape index: {}]   ;;  %s1839_s1 = inlined_call_operand.vmem [shape: bf16[2,4], index: 1, kind: input, shape index: {}]   ;;  %s1840_s2 = inlined_call_operand.vmem [shape: f32[2,1], index: 2, kind: input, shape index: {}]   ;;  %s1841_s3 = inlined_call_operand.vmem [shape: bf16[4,18,2], index: 3, kind: input, shape index: {}]   ;;  %s1842_s4 = inlined_call_operand.vmem [shape: f32[18,1], index: 4, kind: input, shape index: {}]   ;;  %s1843_s5 = inlined_call_operand.vmem [shape: f32[8,1], index: 5, kind: input, shape index: {}]   ;;  %s1844_s6 = inlined_call_operand.hbm [shape: f32[2,8,256], index: 6, kind: output, shape index: {}]  }
   0x1   :  { %13 = vsyncpa [#allocation3 + $0x1], 0  ;;  %s1411_s21 = smov 0   ;;  %s1413_s22 = smov 0  }
   0x2   :  { %s1415_s23 = smov 0   ;;  %s1417_s24 = smov 0  }
   0x3 LB: > { %s1432_s25 = sadd.s32 4294967295, %s1363_s24   ;;  %s1180_s26 = sadd.s32 4294967294, %s1363_s24   ;;  %s1363_s24 = sphi %s1417_s24, %s1850_s24   ;;  %s1359_s23 = sphi %s1415_s23, %s1849_s23   ;;  %s1355_s22 = sphi %s1413_s22, %s1848_s22   ;;  %s1351_s21 = sphi %s1411_s21, %s1847_s21  }
   0x4   : > { %s1436_s27 = sadd.s32 1, %s1363_s24   ;;  %s157_s28 = sadd.s32 1, %s1359_s23 }
   0x5   : > { %s154_s29 = ssub.s32 %s1363_s24, %s1436_s27  ;;  %p167_p0 = scmp.ne.s32.totalorder %s1359_s23, %s1355_s22 }
   0x6   : > { %p155_p1 = scmp.eq.s32.totalorder %s154_s29, 0  ;;  %p168_p2 = scmp.eq.s32.totalorder %s1432_s25, 1 }
   0x7   : > { %p173_p3 = scmp.ne.s32.totalorder %s1355_s22, %s1351_s21  ;;  %p174_p4 = scmp.eq.s32.totalorder %s1180_s26, 1 }
   0x8   : > { %s1447_s30 = scalar_select %p155_p1, %s1359_s23, %s157_s28  }
   0x9   : > { %p1449_p5 = por %p168_p2, %p167_p0  ;;  %p1453_p6 = por %p174_p4, %p173_p3 }
   0xa   : > { %p1183_p7 = scmp.ge.s32.totalorder %s1363_s24, 1  ;;  %p215_p8 = scmp.lt.s32.totalorder %s1363_s24, 3 }
   0xc   : > { %p216_p9 = pnand %p1183_p7, %p215_p8 }
   0xd   : > { %p245_p10 = scmp.lt.s32.totalorder (!%p216_p9), %s1432_s25, 1  ;;  %s1366_s18 = smov (!%p216_p9), 1  }
   0xe   : > { %219 = sbr.rel (%p216_p9) target bundleno = 1880 (0x758), region = 44  ;;  %s1367_s19 = smov (!%p216_p9), 2  }
   0xf   : > { %s1368_s20 = smov (!%p216_p9), 127   ;;  %s1369_s26 = smov (!%p216_p9), 126  }
  0x10   : > { %s1371_s28 = smov (!%p216_p9), 32   ;;  %s1372_s29 = smov (!%p216_p9), 16  }
  0x11   : > { %s1373_s9 = smov (!%p216_p9), 112   ;;  %s1374_s10 = smov (!%p216_p9), 96  }
  0x13   : > { %v1365_v0 = vmov 0   ;;  %v253_v1 = vld [vmem:[%s1840_s2] sm:$0x3]  ;;  %s246_s11 = scalar_select %p245_p10, %s1432_s25, 1  ;;  %vm272_vm0 = vcmask 1041408   ;;  %vm268_vm1 = vcmask 31744   ;;  %v330_v26 = vlaneseq }
  0x14   : > { %311 = vmatprep.mubr.bf16.mxu0 %v1365_v0  ;;  %1275 = vset.pattern.permute.xlu0 %v1365_v0  ;;  %v252_v5 = vld [vmem:[%s1839_s1] sm:$0x1]  ;;  %vm713_vm2 = vcmask 1040384   ;;  %v1370_v39 = vmov -inf  }
  0x15   : > { %256 = vperm.xlu0 %1275, %v253_v1   ;;  %752 = vmatprep.mubr.bf16.mxu1 %v1365_v0  ;;  %s1224_s12 = sshll.u32 %s246_s11, 2  ;;  %v1502_v27 = vand.u32 127, %v330_v26  ;;  %s1225_s11 = sshll.u32 %s1432_s25, 8 }
  0x16   : > { %1276 = vset.pattern.permute.xlu1 %v1365_v0  ;;  %s249_s15 = scalar_lea.vmem %s1838_s0, %s1224_s12  ;;  %s1375_s25 = smov [#allocation2]  }
  0x17   : > { %v1187_v2 = vld.sshfl [vmem:[%s249_s15] sm:$0x33 pattern:$0x76325410]  ;;  %v1505_v28 = vadd.s32 128, %v1502_v27  ;;  %v337_v29 = vand.u32 15, %v1502_v27 }
  0x18   : > { %v267_v3 = vcombine.high %v1187_v2, %v1187_v2  ;;  %v274_v4 = vsel %vm272_vm0, %v1187_v2, 0  ;;  %vm443_vm7 = vcmp.lt.s32.totalorder %v1502_v27, 2  ;;  %vm454_vm8 = vcmp.lt.s32.totalorder %v1502_v27, 1  ;;  %s1307_s15 = sshll.u32 %s1375_s25, 4  ;;  %s1308_s15 = int_to_ptr.vmem [resolvable:$false] %s1307_s15 }
  0x19   : > { %v344_v30 = vand.u32 15, %v1505_v28  ;;  %v359_v31 = vadd.s32 4294967294, %v337_v29  ;;  %v369_v33 = vadd.s32 4294967295, %v337_v29  ;;  %v379_v37 = vadd.s32 1, %v337_v29  ;;  %s1309_s16 = scalar_lea.vmem %s1308_s15, 512 }
  0x1a   : > { %1188 = vmatprep.subr.msk.bf16.mxu0 %vm272_vm0, %v267_v3  ;;  %v389_v48 = vadd.s32 2, %v337_v29  ;;  %vm465_vm11 = vcmp.lt.s32.totalorder %v1502_v27, 127  ;;  %vm476_vm14 = vcmp.lt.s32.totalorder %v1502_v27, 126  ;;  %vm487_vm0 = vcmp.lt.s32.totalorder %v1502_v27, 32 }
  0x1b   : > { %294 = vmatpush1.bf16.msra.mxu0 %v274_v4  ;;  %v360_v32 = vadd.s32 4294967294, %v344_v30  ;;  %v370_v34 = vadd.s32 4294967295, %v344_v30  ;;  %vm361_vm3 = vcmp.ge.s32.totalorder %v359_v31, 0  ;;  %v380_v38 = vadd.s32 1, %v344_v30 }
  0x1c   : > { %vm371_vm5 = vcmp.ge.s32.totalorder %v369_v33, 0  ;;  %v1511_v40 = vsel %vm361_vm3, 0.0, %v1370_v39  ;;  %vm383_vm9 = vcmp.le.s32.totalorder %v379_v37, 15  ;;  %v390_v49 = vadd.s32 2, %v344_v30 }
  0x1d   : > { %vm362_vm4 = vcmp.ge.s32.totalorder %v360_v32, 0  ;;  %vm372_vm6 = vcmp.ge.s32.totalorder %v370_v34, 0  ;;  %v1518_v43 = vsel %vm371_vm5, 0.0, %v1370_v39  ;;  %vm384_vm10 = vcmp.le.s32.totalorder %v380_v38, 15 }
  0x1e   : > { %1189 = vmatmul.mubr.msk.bf16.vlgmr.msra.gmra.mxu0 %vm268_vm1, %v252_v5  ;;  %v1514_v41 = vsel %vm362_vm4, 0.0, %v1370_v39  ;;  %v1521_v44 = vsel %vm372_vm6, 0.0, %v1370_v39  ;;  %v1537_v57 = vsel %vm383_vm9, 0.0, %v1370_v39  ;;  %v1540_v58 = vsel %vm384_vm10, 0.0, %v1370_v39 }
  0x1f   : > { %823 = vmatprep.mubr.bf16.mxu0 %v1365_v0  ;;  %vm393_vm12 = vcmp.le.s32.totalorder %v389_v48, 15  ;;  %vm394_vm13 = vcmp.le.s32.totalorder %v390_v49, 15  ;;  %vm498_vm3 = vcmp.lt.s32.totalorder %v1502_v27, 16  ;;  %v430_v31 = vadd.s32 32, %v1505_v28 }
  0x20   : > { %vm509_vm5 = vcmp.lt.s32.totalorder %v1502_v27, 112  ;;  %vm520_vm9 = vcmp.lt.s32.totalorder %v1502_v27, 96  ;;  %vm706_vm10 = vcmask 15360  }
  0x21   : > { %vm434_vm6 = vcmp.le.s32.totalorder %v430_v31, 255 }
  0x22   : > { %v1604_v49 = vsel %vm434_vm6, 0.0, %v1370_v39 }
  0x90   : > { %v257_v6 = vpop.permute.xlu0 %256 }
  0xde   : > { %v313_v7 = vpop.f32.mrf.mxu0 }
  0xdf   : > { %v314_v8 = vadd.f32 %v313_v7, %v257_v6  ;;  %v1555_v7 = vsel %vm394_vm13, 0.0, %v1370_v39 }
  0xe0   : > { %v315_v9 = vpop.f32.mrf.mxu0 }
  0xe1   : > { %v320_v10 = vmul.f32 0.5, %v314_v8  ;;  %v316_v11 = vadd.f32 %v315_v9, %v257_v6  ;;  %v1552_v6 = vsel %vm393_vm12, 0.0, %v1370_v39 }
  0xe2   : > { %v317_v12 = vpop.f32.mrf.mxu0 }
  0xe3   : > { %1285 = vtanh.f32 %v320_v10  ;;  %v321_v13 = vmul.f32 0.5, %v316_v11 }
  0xe4   : > { %v318_v14 = vpop.f32.mrf.mxu0 }
  0xe5   : > { %1287 = vtanh.f32 %v321_v13 }
  0xf0   : > { %v1286_v15 = vpop.eup %1285 }
  0xf1   : > { %v324_v16 = vadd.f32 1.0, %v1286_v15 }
  0xf2   : > { %v1288_v17 = vpop.eup %1287 }
  0xf3   : > { %v326_v18 = vmul.f32 0.5, %v324_v16  ;;  %v325_v19 = vadd.f32 1.0, %v1288_v17  ;;  %v399_v17 = vadd.s32 4294967264, %v1502_v27 }
  0xf5   : > { %v1475_v20 = vmul.f32 %v326_v18, %v314_v8  ;;  %v327_v21 = vmul.f32 0.5, %v325_v19  ;;  %vm401_vm15 = vcmp.ge.s32.totalorder %v399_v17, 0  ;;  %v409_v18 = vadd.s32 4294967280, %v1502_v27  ;;  %v1284_v27 = vld [vmem:[%s1841_s3 + $0x2c] ss:$0 sps:$4 sm:$0x11]  }
  0xf6   : > { %v1575_v19 = vsel %vm401_vm15, 0.0, %v1370_v39 }
  0xf7   : > { %v1477_v22 = vmul.f32 %v327_v21, %v316_v11  ;;  %450 = vrot.lane.b32.xlu1 %v1475_v20, %s1366_s18  ;;  %439 = vrot.lane.b32.xlu0 %v1475_v20, %s1367_s19  ;;  %v690_v23 = vpack.c.bf16 %v1475_v20, %v1475_v20  ;;  %vm411_vm1 = vcmp.ge.s32.totalorder %v409_v18, 0 }
  0xf9   : > { %v691_v24 = vpack.c.bf16 %v1477_v22, %v1477_v22  ;;  %v786_v25 = vsel %vm713_vm2, %v690_v23, 0 }
  0xfb   : > { %1200 = vmatprep.subr.msk.bf16.mxu0 %vm713_vm2, %v691_v24  ;;  %441 = vrot.lane.b32.xlu1 %v1477_v22, %s1367_s19 }
  0xfc   : > { %452 = vrot.lane.b32.xlu0 %v1477_v22, %s1366_s18  ;;  %806 = vmatpush1.bf16.msra.mxu0 %v786_v25  ;;  %v1583_v25 = vsel %vm411_vm1, 0.0, %v1370_v39 }
  0xff   : > { %461 = vrot.lane.b32.xlu1 %v1475_v20, %s1368_s20 }
 0x100   : > { %463 = vrot.lane.b32.xlu0 %v1477_v22, %s1368_s20 }
 0x103   : > { %472 = vrot.lane.b32.xlu1 %v1475_v20, %s1369_s26 }
 0x104   : > { %474 = vrot.lane.b32.xlu0 %v1477_v22, %s1369_s26 }
 0x169   : > { %v451_v35 = vpop.permute.xlu1 %450  ;;  %v440_v36 = vpop.permute.xlu0 %439 }
 0x16d   : > { %v442_v42 = vpop.permute.xlu1 %441 }
 0x16e   : > { %v444_v45 = vsel %vm443_vm7, %v440_v36, %v442_v42  ;;  %v445_v46 = vsel %vm443_vm7, %v442_v42, %v440_v36  ;;  %v453_v47 = vpop.permute.xlu0 %452 }
 0x16f   : > { %v446_v50 = vadd.f32 %v445_v46, %v1511_v40  ;;  %v447_v51 = vadd.f32 %v444_v45, %v1514_v41  ;;  %v455_v52 = vsel %vm454_vm8, %v451_v35, %v453_v47  ;;  %v456_v53 = vsel %vm454_vm8, %v453_v47, %v451_v35 }
 0x170   : > { %v457_v59 = vadd.f32 %v456_v53, %v1518_v43  ;;  %v458_v60 = vadd.f32 %v455_v52, %v1521_v44 }
 0x171   : > { %v448_v54 = vmax.f32 %v1475_v20, %v446_v50  ;;  %v449_v55 = vmax.f32 %v1477_v22, %v447_v51  ;;  %v462_v56 = vpop.permute.xlu1 %461  ;;  %v420_v22 = vadd.s32 16, %v1505_v28 }
 0x172   : > { %v464_v61 = vpop.permute.xlu0 %463 }
 0x173   : > { %v466_v62 = vsel %vm465_vm11, %v462_v56, %v464_v61  ;;  %v467_v63 = vsel %vm465_vm11, %v464_v61, %v462_v56  ;;  %v459_v1 = vmax.f32 %v448_v54, %v457_v59  ;;  %v460_v2 = vmax.f32 %v449_v55, %v458_v60 }
 0x174   : > { %v468_v3 = vadd.f32 %v466_v62, %v1537_v57  ;;  %v469_v4 = vadd.f32 %v467_v63, %v1540_v58  ;;  %vm424_vm4 = vcmp.le.s32.totalorder %v420_v22, 255 }
 0x175   : > { %v473_v5 = vpop.permute.xlu1 %472  ;;  %v1593_v36 = vsel %vm424_vm4, 0.0, %v1370_v39 }
 0x176   : > { %v475_v8 = vpop.permute.xlu0 %474  ;;  %v470_v11 = vmax.f32 %v459_v1, %v468_v3  ;;  %v471_v12 = vmax.f32 %v460_v2, %v469_v4 }
 0x177   : > { %v477_v9 = vsel %vm476_vm14, %v473_v5, %v475_v8  ;;  %v478_v10 = vsel %vm476_vm14, %v475_v8, %v473_v5 }
 0x178   : > { %v479_v13 = vadd.f32 %v477_v9, %v1552_v6  ;;  %v480_v14 = vadd.f32 %v478_v10, %v1555_v7 }
 0x17a   : > { %v481_v15 = vmax.f32 %v470_v11, %v479_v13  ;;  %v482_v16 = vmax.f32 %v471_v12, %v480_v14 }
 0x17c   : > { %485 = vrot.lane.b32.xlu0 %v482_v16, %s1371_s28  ;;  %483 = vrot.lane.b32.xlu1 %v481_v15, %s1371_s28 }
 0x180   : > { %496 = vrot.lane.b32.xlu0 %v482_v16, %s1372_s29  ;;  %494 = vrot.lane.b32.xlu1 %v481_v15, %s1372_s29 }
 0x184   : > { %507 = vrot.lane.b32.xlu0 %v482_v16, %s1373_s9  ;;  %505 = vrot.lane.b32.xlu1 %v481_v15, %s1373_s9 }
 0x188   : > { %518 = vrot.lane.b32.xlu0 %v482_v16, %s1374_s10  ;;  %516 = vrot.lane.b32.xlu1 %v481_v15, %s1374_s10 }
 0x1ee   : > { %v486_v20 = vpop.permute.xlu0 %485  ;;  %v484_v21 = vpop.permute.xlu1 %483 }
 0x1ef   : > { %v489_v23 = vsel %vm487_vm0, %v486_v20, %v484_v21  ;;  %v488_v35 = vsel %vm487_vm0, %v484_v21, %v486_v20 }
 0x1f0   : > { %v490_v24 = vadd.f32 %v489_v23, %v1575_v19  ;;  %v493_v47 = vmax.f32 %v482_v16, %v488_v35 }
 0x1f2   : > { %v497_v29 = vpop.permute.xlu0 %496  ;;  %v495_v30 = vpop.permute.xlu1 %494  ;;  %v492_v33 = vmax.f32 %v481_v15, %v490_v24 }
 0x1f3   : > { %v500_v32 = vsel %vm498_vm3, %v497_v29, %v495_v30  ;;  %v499_v28 = vsel %vm498_vm3, %v495_v30, %v497_v29 }
 0x1f4   : > { %v501_v34 = vadd.f32 %v500_v32, %v1583_v25  ;;  %v504_v50 = vmax.f32 %v493_v47, %v499_v28 }
 0x1f6   : > { %v508_v37 = vpop.permute.xlu0 %507  ;;  %v503_v38 = vmax.f32 %v492_v33, %v501_v34  ;;  %v506_v42 = vpop.permute.xlu1 %505 }
 0x1f7   : > { %v510_v45 = vsel %vm509_vm5, %v506_v42, %v508_v37  ;;  %v511_v46 = vsel %vm509_vm5, %v508_v37, %v506_v42 }
 0x1f8   : > { %v513_v48 = vadd.f32 %v511_v46, %v1593_v36  ;;  %v514_v51 = vmax.f32 %v503_v38, %v510_v45  ;;  %v1277_v45 = vld [vmem:[%s1841_s3 + $0xc] sm:$0xff]  }
 0x1fa   : > { %v519_v52 = vpop.permute.xlu0 %518  ;;  %v517_v53 = vpop.permute.xlu1 %516  ;;  %v515_v56 = vmax.f32 %v504_v50, %v513_v48 }
 0x1fb   : > { %v521_v54 = vsel %vm520_vm9, %v517_v53, %v519_v52  ;;  %v522_v55 = vsel %vm520_vm9, %v519_v52, %v517_v53 }
 0x1fc   : > { %v524_v59 = vadd.f32 %v522_v55, %v1604_v49  ;;  %v525_v60 = vmax.f32 %v514_v51, %v521_v54 }
 0x1fe   : > { %v526_v61 = vmax.f32 %v515_v56, %v524_v59  ;;  %527 = vrot.lane.b32.xlu1 %v525_v60, %s1367_s19  ;;  %v696_v62 = vpack.c.bf16 %v525_v60, %v525_v60 }
 0x200   : > { %529 = vrot.lane.b32.xlu0 %v526_v61, %s1367_s19  ;;  %v697_v39 = vpack.c.bf16 %v526_v61, %v526_v61  ;;  %v715_v63 = vsel %vm713_vm2, %v696_v62, 0 }
 0x202   : > { %1195 = vmatprep.subr.msk.bf16.mxu1 %vm713_vm2, %v697_v39  ;;  %537 = vrot.lane.b32.xlu1 %v525_v60, %s1366_s18 }
 0x203   : > { %735 = vmatpush1.bf16.msra.mxu1 %v715_v63 }
 0x204   : > { %539 = vrot.lane.b32.xlu0 %v526_v61, %s1366_s18 }
 0x206   : > { %547 = vrot.lane.b32.xlu1 %v525_v60, %s1368_s20  ;;  %1196 = vmatmul.mubr.msk.bf16.vlgmr.msra.gmra.mxu1 %vm706_vm10, %v1277_v45 }
 0x207   : > { %762 = vmatprep.mubr.bf16.mxu1 %v1365_v0 }
 0x208   : > { %549 = vrot.lane.b32.xlu0 %v526_v61, %s1368_s20 }
 0x20a   : > { %557 = vrot.lane.b32.xlu1 %v525_v60, %s1369_s26 }
 0x20c   : > { %559 = vrot.lane.b32.xlu0 %v526_v61, %s1369_s26 }
 0x270   : > { %v528_v1 = vpop.permute.xlu1 %527 }
 0x272   : > { %v530_v2 = vpop.permute.xlu0 %529 }
 0x273   : > { %v531_v4 = vsel %vm443_vm7, %v528_v1, %v530_v2  ;;  %v532_v5 = vsel %vm443_vm7, %v530_v2, %v528_v1 }
 0x274   : > { %v538_v3 = vpop.permute.xlu1 %537  ;;  %v533_v11 = vadd.f32 %v532_v5, %v1511_v40  ;;  %v534_v12 = vadd.f32 %v531_v4, %v1514_v41 }
 0x276   : > { %v540_v8 = vpop.permute.xlu0 %539  ;;  %v535_v20 = vmax.f32 %v525_v60, %v533_v11  ;;  %v536_v21 = vmax.f32 %v526_v61, %v534_v12 }
 0x277   : > { %v541_v9 = vsel %vm454_vm8, %v538_v3, %v540_v8  ;;  %v542_v10 = vsel %vm454_vm8, %v540_v8, %v538_v3 }
 0x278   : > { %v548_v13 = vpop.permute.xlu1 %547  ;;  %v543_v14 = vadd.f32 %v542_v10, %v1518_v43  ;;  %v544_v15 = vadd.f32 %v541_v9, %v1521_v44 }
 0x27a   : > { %v550_v16 = vpop.permute.xlu0 %549  ;;  %v545_v24 = vmax.f32 %v535_v20, %v543_v14  ;;  %v546_v29 = vmax.f32 %v536_v21, %v544_v15 }
 0x27b   : > { %v551_v17 = vsel %vm465_vm11, %v548_v13, %v550_v16  ;;  %v552_v18 = vsel %vm465_vm11, %v550_v16, %v548_v13 }
 0x27c   : > { %v553_v22 = vadd.f32 %v551_v17, %v1537_v57  ;;  %v554_v23 = vadd.f32 %v552_v18, %v1540_v58  ;;  %v558_v30 = vpop.permute.xlu1 %557  ;;  %v1278_v18 = vld [vmem:[%s1841_s3 + $0x14] ss:$0 sps:$4 sm:$0x11]  }
 0x27d   : > { %1197 = vmatmul.mubr.msk.bf16.gmra.mxu1 %vm706_vm10, %v1278_v18 }
 0x27e   : > { %v560_v31 = vpop.permute.xlu0 %559  ;;  %v555_v34 = vmax.f32 %v545_v24, %v553_v22  ;;  %v556_v35 = vmax.f32 %v546_v29, %v554_v23  ;;  %900 = vmatprep.mubr.bf16.mxu1 %v1365_v0  ;;  %v1279_v23 = vld [vmem:[%s1841_s3] sm:$0xff]  }
 0x27f   : > { %v561_v32 = vsel %vm476_vm14, %v558_v30, %v560_v31  ;;  %v562_v33 = vsel %vm476_vm14, %v560_v31, %v558_v30  ;;  %1201 = vmatmul.mubr.msk.bf16.vlgmr.msra.gmra.mxu0 %vm706_vm10, %v1279_v23  ;;  %v1280_v31 = vld [vmem:[%s1841_s3 + $0x18] sm:$0xff]  }
 0x280   : > { %v563_v37 = vadd.f32 %v561_v32, %v1552_v6  ;;  %v564_v38 = vadd.f32 %v562_v33, %v1555_v7  ;;  %833 = vmatprep.mubr.bf16.mxu0 %v1365_v0 }
 0x282   : > { %v565_v42 = vmax.f32 %v555_v34, %v563_v37  ;;  %v566_v28 = vmax.f32 %v556_v35, %v564_v38 }
 0x284   : > { %569 = vrot.lane.b32.xlu0 %v566_v28, %s1371_s28  ;;  %567 = vrot.lane.b32.xlu1 %v565_v42, %s1371_s28 }
 0x288   : > { %579 = vrot.lane.b32.xlu0 %v566_v28, %s1372_s29  ;;  %577 = vrot.lane.b32.xlu1 %v565_v42, %s1372_s29 }
 0x28c   : > { %589 = vrot.lane.b32.xlu0 %v566_v28, %s1373_s9  ;;  %587 = vrot.lane.b32.xlu1 %v565_v42, %s1373_s9 }
 0x290   : > { %599 = vrot.lane.b32.xlu0 %v566_v28, %s1374_s10  ;;  %597 = vrot.lane.b32.xlu1 %v565_v42, %s1374_s10 }
 0x2f6   : > { %v570_v46 = vpop.permute.xlu0 %569  ;;  %v568_v47 = vpop.permute.xlu1 %567 }
 0x2f7   : > { %v572_v48 = vsel %vm487_vm0, %v570_v46, %v568_v47  ;;  %v571_v56 = vsel %vm487_vm0, %v568_v47, %v570_v46 }
 0x2f8   : > { %v573_v50 = vadd.f32 %v572_v48, %v1575_v19  ;;  %v576_v1 = vmax.f32 %v566_v28, %v571_v56 }
 0x2fa   : > { %v580_v51 = vpop.permute.xlu0 %579  ;;  %v578_v52 = vpop.permute.xlu1 %577  ;;  %v575_v54 = vmax.f32 %v565_v42, %v573_v50 }
 0x2fb   : > { %v582_v53 = vsel %vm498_vm3, %v580_v51, %v578_v52  ;;  %v581_v62 = vsel %vm498_vm3, %v578_v52, %v580_v51 }
 0x2fc   : > { %v583_v55 = vadd.f32 %v582_v53, %v1583_v25  ;;  %v586_v3 = vmax.f32 %v576_v1, %v581_v62 }
 0x2fe   : > { %v590_v59 = vpop.permute.xlu0 %589  ;;  %v585_v60 = vmax.f32 %v575_v54, %v583_v55  ;;  %v588_v61 = vpop.permute.xlu1 %587 }
 0x2ff   : > { %v591_v39 = vsel %vm509_vm5, %v588_v61, %v590_v59  ;;  %v592_v63 = vsel %vm509_vm5, %v590_v59, %v588_v61  ;;  %v1283_v61 = vld [vmem:[%s1841_s3 + $0x20] ss:$0 sps:$4 sm:$0x11]  }
 0x300   : > { %v594_v2 = vadd.f32 %v592_v63, %v1593_v36  ;;  %v595_v4 = vmax.f32 %v585_v60, %v591_v39 }
 0x302   : > { %v600_v5 = vpop.permute.xlu0 %599  ;;  %v598_v8 = vpop.permute.xlu1 %597  ;;  %v596_v11 = vmax.f32 %v586_v3, %v594_v2 }
 0x303   : > { %v601_v9 = vsel %vm520_vm9, %v598_v8, %v600_v5  ;;  %v602_v10 = vsel %vm520_vm9, %v600_v5, %v598_v8 }
 0x304   : > { %v604_v12 = vadd.f32 %v602_v10, %v1604_v49  ;;  %v605_v13 = vmax.f32 %v595_v4, %v601_v9 }
 0x306   : > { %v606_v14 = vmax.f32 %v596_v11, %v604_v12  ;;  %607 = vrot.lane.b32.xlu1 %v605_v13, %s1367_s19  ;;  %v846_v15 = vpack.c.bf16 %v605_v13, %v605_v13 }
 0x308   : > { %609 = vrot.lane.b32.xlu0 %v606_v14, %s1367_s19  ;;  %v847_v16 = vpack.c.bf16 %v606_v14, %v606_v14  ;;  %v863_v17 = vsel %vm713_vm2, %v846_v15, 0 }
 0x30a   : > { %617 = vrot.lane.b32.xlu1 %v605_v13, %s1366_s18  ;;  %1208 = vmatprep.subr.msk.bf16.mxu1 %vm713_vm2, %v847_v16 }
 0x30b   : > { %883 = vmatpush1.bf16.msra.mxu1 %v863_v17 }
 0x30c   : > { %619 = vrot.lane.b32.xlu0 %v606_v14, %s1366_s18 }
 0x30e   : > { %627 = vrot.lane.b32.xlu1 %v605_v13, %s1368_s20  ;;  %1209 = vmatmul.mubr.msk.bf16.vlgmr.msra.gmra.mxu1 %vm706_vm10, %v1280_v31 }
 0x30f   : > { %910 = vmatprep.mubr.bf16.mxu1 %v1365_v0 }
 0x310   : > { %629 = vrot.lane.b32.xlu0 %v606_v14, %s1368_s20  ;;  %s242_s20 = sand.u32 1, %s1355_s22  }
 0x312   : > { %637 = vrot.lane.b32.xlu1 %v605_v13, %s1369_s26 }
 0x314   : > { %639 = vrot.lane.b32.xlu0 %v606_v14, %s1369_s26  ;;  %s1184_s26 = sshll.u32 %s242_s20, 4 }
 0x315   : > { %s244_s12 = scalar_lea.vmem [#allocation2], %s1184_s26 }
 0x316   : > { %1210 = vmatmul.mubr.msk.bf16.gmra.mxu1 %vm706_vm10, %v1283_v61  ;;  %s1121_s13 = sshll.u32 %s244_s12, 4  ;;  %s1122_s13 = int_to_ptr.vmem [resolvable:$true] %s1121_s13 }
 0x317   : > { %s1303_s14 = scalar_lea.vmem %s1122_s13, 256  ;;  %p1310_p0 = scmp.lt.s32.totalorder %s1122_s13, %s1308_s15 }
 0x318   : > { %p1304_p11 = scmp.ne.s32.totalorder %s1122_s13, %s1303_s14  ;;  %p1311_p1 = scmp.lt.s32.totalorder %s1309_s16, %s1303_s14 }
 0x31a   : > { %p1305_p12 = pnand %p1304_p11, %p1449_p5  ;;  %p1312_p2 = por %p1311_p1, %p1310_p0 }
 0x31c   : > { %p1306_p13 = pneg %p1305_p12 }
 0x31e   : > { %p1313_p3 = pnand %p1312_p2, %p1306_p13 }
 0x378   : > { %v608_v20 = vpop.permute.xlu1 %607 }
 0x37a   : > { %v610_v21 = vpop.permute.xlu0 %609 }
 0x37b   : > { %v611_v24 = vsel %vm443_vm7, %v608_v20, %v610_v21  ;;  %v612_v29 = vsel %vm443_vm7, %v610_v21, %v608_v20 }
 0x37c   : > { %v618_v22 = vpop.permute.xlu1 %617  ;;  %v613_v34 = vadd.f32 %v612_v29, %v1511_v40  ;;  %v614_v35 = vadd.f32 %v611_v24, %v1514_v41 }
 0x37e   : > { %v620_v30 = vpop.permute.xlu0 %619  ;;  %v615_v47 = vmax.f32 %v605_v13, %v613_v34  ;;  %v616_v40 = vmax.f32 %v606_v14, %v614_v35 }
 0x37f   : > { %v621_v32 = vsel %vm454_vm8, %v618_v22, %v620_v30  ;;  %v622_v33 = vsel %vm454_vm8, %v620_v30, %v618_v22 }
 0x380   : > { %v628_v37 = vpop.permute.xlu1 %627  ;;  %v623_v38 = vadd.f32 %v622_v33, %v1518_v43  ;;  %v624_v42 = vadd.f32 %v621_v32, %v1521_v44  ;;  %v1281_v43 = vld [vmem:[%s1841_s3 + $0x8] ss:$0 sps:$4 sm:$0x11]  }
 0x381   : > { %1202 = vmatmul.mubr.msk.bf16.gmra.mxu0 %vm706_vm10, %v1281_v43  ;;  %v1282_v32 = vld [vmem:[%s1841_s3 + $0x24] sm:$0xff]  }
 0x382   : > { %v630_v28 = vpop.permute.xlu0 %629  ;;  %v625_v50 = vmax.f32 %v615_v47, %v623_v38  ;;  %v626_v51 = vmax.f32 %v616_v40, %v624_v42  ;;  %983 = vmatprep.mubr.bf16.mxu0 %v1365_v0 }
 0x383   : > { %v631_v45 = vsel %vm465_vm11, %v628_v37, %v630_v28  ;;  %v632_v46 = vsel %vm465_vm11, %v630_v28, %v628_v37  ;;  %v825_v28 = vpop.f32.mrf.mxu0 }
 0x384   : > { %v633_v41 = vadd.f32 %v631_v45, %v1537_v57  ;;  %v634_v48 = vadd.f32 %v632_v46, %v1540_v58  ;;  %v638_v52 = vpop.permute.xlu1 %637 }
 0x385   : > { %v827_v47 = vpop.f32.mrf.mxu0 }
 0x386   : > { %v640_v53 = vpop.permute.xlu0 %639  ;;  %v635_v55 = vmax.f32 %v625_v50, %v633_v41  ;;  %v636_v56 = vmax.f32 %v626_v51, %v634_v48 }
 0x387   : > { %v641_v44 = vsel %vm476_vm14, %v638_v52, %v640_v53  ;;  %v642_v54 = vsel %vm476_vm14, %v640_v53, %v638_v52  ;;  %v829_v48 = vpop.f32.mrf.mxu0 }
 0x388   : > { %v643_v57 = vadd.f32 %v641_v44, %v1552_v6  ;;  %v644_v58 = vadd.f32 %v642_v54, %v1555_v7  ;;  %v1010_v6 = vld [vmem:[%s1842_s4 + $0x10] sm:$0x3] }
 0x389   : > { %v831_v53 = vpop.f32.mrf.mxu0 }
 0x38a   : > { %v645_v59 = vmax.f32 %v635_v55, %v643_v57  ;;  %v646_v60 = vmax.f32 %v636_v56, %v644_v58 }
 0x38c   : > { %649 = vrot.lane.b32.xlu0 %v646_v60, %s1371_s28  ;;  %647 = vrot.lane.b32.xlu1 %v645_v59, %s1371_s28 }
 0x390   : > { %659 = vrot.lane.b32.xlu0 %v646_v60, %s1372_s29  ;;  %657 = vrot.lane.b32.xlu1 %v645_v59, %s1372_s29 }
 0x394   : > { %669 = vrot.lane.b32.xlu0 %v646_v60, %s1373_s9  ;;  %667 = vrot.lane.b32.xlu1 %v645_v59, %s1373_s9  ;;  %s1803_s9 = scalar_lea.hbm %s1844_s6, %s1225_s11 }
 0x398   : > { %679 = vrot.lane.b32.xlu0 %v646_v60, %s1374_s10  ;;  %677 = vrot.lane.b32.xlu1 %v645_v59, %s1374_s10  ;;  %s1107_s10 = scalar_lea.sflag [#allocation3], %s242_s20 }
 0x39c   : > { %1023 = vperm.xlu1 %1276, %v1010_v6  }
 0x3fe   : > { %v650_v7 = vpop.permute.xlu0 %649  ;;  %v648_v62 = vpop.permute.xlu1 %647 }
 0x3ff   : > { %v652_v39 = vsel %vm487_vm0, %v650_v7, %v648_v62  ;;  %v651_v8 = vsel %vm487_vm0, %v648_v62, %v650_v7 }
 0x400   : > { %v653_v63 = vadd.f32 %v652_v39, %v1575_v19  ;;  %v656_v14 = vmax.f32 %v646_v60, %v651_v8 }
 0x402   : > { %v660_v1 = vpop.permute.xlu0 %659  ;;  %v658_v2 = vpop.permute.xlu1 %657  ;;  %v655_v4 = vmax.f32 %v645_v59, %v653_v63 }
 0x403   : > { %v662_v3 = vsel %vm498_vm3, %v660_v1, %v658_v2  ;;  %v661_v12 = vsel %vm498_vm3, %v658_v2, %v660_v1 }
 0x404   : > { %v663_v5 = vadd.f32 %v662_v3, %v1583_v25  ;;  %v666_v16 = vmax.f32 %v656_v14, %v661_v12 }
 0x406   : > { %v670_v9 = vpop.permute.xlu0 %669  ;;  %v665_v10 = vmax.f32 %v655_v4, %v663_v5  ;;  %v668_v11 = vpop.permute.xlu1 %667 }
 0x407   : > { %v671_v19 = vsel %vm509_vm5, %v668_v11, %v670_v9  ;;  %v672_v13 = vsel %vm509_vm5, %v670_v9, %v668_v11 }
 0x408   : > { %v674_v15 = vadd.f32 %v672_v13, %v1593_v36  ;;  %v675_v25 = vmax.f32 %v665_v10, %v671_v19 }
 0x40a   : > { %v680_v17 = vpop.permute.xlu0 %679  ;;  %v678_v18 = vpop.permute.xlu1 %677  ;;  %v676_v22 = vmax.f32 %v666_v16, %v674_v15 }
 0x40b   : > { %v681_v20 = vsel %vm520_vm9, %v678_v18, %v680_v17  ;;  %v682_v21 = vsel %vm520_vm9, %v680_v17, %v678_v18 }
 0x40c   : > { %v684_v23 = vadd.f32 %v682_v21, %v1604_v49  ;;  %v685_v24 = vmax.f32 %v675_v25, %v681_v20  ;;  %v754_v49 = vpop.f32.mrf.mxu1 }
 0x40d   : > { %v826_v46 = vadd.f32 %v825_v28, %v754_v49 }
 0x40e   : > { %v686_v29 = vmax.f32 %v676_v22, %v684_v23  ;;  %v929_v30 = vpack.c.bf16 %v685_v24, %v685_v24  ;;  %v756_v33 = vpop.f32.mrf.mxu1  ;;  %v1008_v24 = vld [vmem:[%s1842_s4] sm:$0xff] }
 0x40f   : > { %v828_v41 = vadd.f32 %v827_v47, %v756_v33 }
 0x410   : > { %v930_v31 = vpack.c.bf16 %v686_v29, %v686_v29  ;;  %v946_v36 = vsel %vm713_vm2, %v929_v30, 0  ;;  %v758_v34 = vpop.f32.mrf.mxu1 }
 0x411   : > { %v830_v51 = vadd.f32 %v829_v48, %v758_v34 }
 0x412   : > { %1216 = vmatprep.subr.msk.bf16.mxu0 %vm713_vm2, %v930_v31  ;;  %v760_v35 = vpop.f32.mrf.mxu1  ;;  %vm1042_vm2 = vcmask 1041409  }
 0x413   : > { %966 = vmatpush1.bf16.msra.mxu0 %v946_v36  ;;  %v832_v44 = vadd.f32 %v831_v53, %v760_v35  ;;  %v1009_v53 = vld [vmem:[%s1842_s4 + $0x8] sm:$0xff] }
 0x414   : > { %v764_v37 = vpop.f32.mrf.mxu1 }
 0x416   : > { %1217 = vmatmul.mubr.msk.bf16.vlgmr.msra.gmra.mxu0 %vm706_vm10, %v1282_v32  ;;  %v766_v38 = vpop.f32.mrf.mxu1 }
 0x417   : > { %993 = vmatprep.mubr.bf16.mxu0 %v1365_v0  ;;  %v1024_v13 = vpop.permute.xlu1 %1023 }
 0x418   : > { %v768_v42 = vpop.f32.mrf.mxu1 }
 0x41a   : > { %v769_v45 = vpop.f32.mrf.mxu1 }
 0x41c   : > { %v902_v40 = vpop.f32.mrf.mxu1 }
 0x41d   : > { %v919_v0 = vadd.f32 %v902_v40, %v826_v46 }
 0x41e   : > { %1218 = vmatmul.mubr.msk.bf16.gmra.mxu0 %vm706_vm10, %v1284_v27  ;;  %v904_v50 = vpop.f32.mrf.mxu1 }
 0x41f   : > { %v920_v52 = vadd.f32 %v904_v50, %v828_v41 }
 0x420   : > { %v906_v43 = vpop.f32.mrf.mxu1 }
 0x421   : > { %v921_v54 = vadd.f32 %v906_v43, %v830_v51 }
 0x422   : > { %v908_v55 = vpop.f32.mrf.mxu1 }
 0x423   : > { %v922_v56 = vadd.f32 %v908_v55, %v832_v44 }
 0x424   : > { %v912_v6 = vpop.f32.mrf.mxu1 }
 0x426   : > { %v914_v39 = vpop.f32.mrf.mxu1 }
 0x428   : > { %v916_v1 = vpop.f32.mrf.mxu1 }
 0x42a   : > { %v917_v2 = vpop.f32.mrf.mxu1 }
 0x441   : > { %v835_v57 = vpop.f32.mrf.mxu0 }
 0x442   : > { %v836_v58 = vadd.f32 %v835_v57, %v764_v37 }
 0x443   : > { %v837_v59 = vpop.f32.mrf.mxu0 }
 0x444   : > { %v838_v60 = vadd.f32 %v837_v59, %v766_v38  ;;  %v923_v62 = vadd.f32 %v912_v6, %v836_v58  ;;  %v1063_v38 = vshrl.u32 %v330_v26, 7  ;;  %v1075_v26 = vld [vmem:[%s1843_s5] sm:$0xff] }
 0x445   : > { %v839_v61 = vpop.f32.mrf.mxu0 }
 0x446   : > { %v924_v63 = vadd.f32 %v914_v39, %v838_v60  ;;  %v1064_v42 = vsub.s32 1, %v1063_v38  ;;  %v1084_v6 = vsub.s32 0, %v1063_v38 }
 0x447   : > { %v840_v7 = vpop.f32.mrf.mxu0 }
 0x4d6   : > { %v985_v3 = vpop.f32.mrf.mxu0 }
 0x4d7   : > { %v1002_v4 = vadd.f32 %v985_v3, %v919_v0 }
 0x4d8   : > { %v987_v5 = vpop.f32.mrf.mxu0 }
 0x4d9   : > { %v1003_v8 = vadd.f32 %v987_v5, %v920_v52 }
 0x4da   : > { %v989_v9 = vpop.f32.mrf.mxu0 }
 0x4db   : > { %v1778_v10 = vadd.f32 %v989_v9, %v921_v54 }
 0x4dc   : > { %v991_v11 = vpop.f32.mrf.mxu0 }
 0x4dd   : > { %v1780_v12 = vadd.f32 %v991_v11, %v922_v56 }
 0x4de   : > { %v995_v19 = vpop.f32.mrf.mxu0 }
 0x4df   : > { %v1006_v14 = vadd.f32 %v995_v19, %v923_v62 }
 0x4e0   : > { %v997_v15 = vpop.f32.mrf.mxu0 }
 0x4e1   : > { %v1030_v16 = vadd.f32 %v1024_v13, %v1006_v14  ;;  %v1007_v25 = vadd.f32 %v997_v15, %v924_v63 }
 0x4e2   : > { %v999_v17 = vpop.f32.mrf.mxu0 }
 0x4e3   : > { %v1031_v18 = vadd.f32 %v1024_v13, %v1007_v25  ;;  %v1043_v21 = vsel %vm1042_vm2, %v1030_v16, -inf  ;;  %v1032_v54 = vmul.f32 0.5, %v1030_v16 }
 0x4e4   : > { %v1000_v20 = vpop.f32.mrf.mxu0 }
 0x4e5   : > { %v1044_v22 = vsel %vm1042_vm2, %v1031_v18, -inf  ;;  %v1033_v55 = vmul.f32 0.5, %v1031_v18 }
 0x4e6   : > { %v1045_v23 = vmax.f32 %v1043_v21, %v1044_v22 }
 0x4e8   : > { %1046 = vmax.xlane.f32.xlu0 %v1045_v23 }
 0x4fe   : > { %1013 = vperm.xlu0 %1275, %v1008_v24  }
 0x571   : > { %v1047_v29 = vpop.xlane.xlu0 %1046 }
 0x572   : > { %v1048_v30 = vsub.f32 %v1030_v16, %v1047_v29  ;;  %v1049_v31 = vsub.f32 %v1031_v18, %v1047_v29 }
 0x574   : > { %v1050_v36 = vmul.f32 1.442695, %v1048_v30  ;;  %v1052_v32 = vmul.f32 1.442695, %v1049_v31 }
 0x576   : > { %1289 = vpow2.f32 %v1050_v36 }
 0x577   : > { %1291 = vpow2.f32 %v1052_v32 }
 0x579   : > { %v1014_v45 = vpop.permute.xlu0 %1013 }
 0x57a   : > { %v1026_v40 = vadd.f32 %v1014_v45, %v1002_v4  ;;  %v1027_v41 = vadd.f32 %v1014_v45, %v1003_v8 }
 0x583   : > { %v1290_v27 = vpop.eup %1289 }
 0x584   : > { %v1292_v49 = vpop.eup %1291  ;;  %v1054_v33 = vsel %vm1042_vm2, %v1290_v27, 0.0 }
 0x585   : > { %v1055_v34 = vsel %vm1042_vm2, %v1292_v49, 0.0 }
 0x586   : > { %v1056_v35 = vadd.f32 %v1055_v34, %v1054_v33 }
 0x588   : > { %1057 = vadd.xlane.f32.xlu1 %v1056_v35 }
 0x611   : > { %v1058_v37 = vpop.xlane.xlu1 %1057 }
 0x612   : > { %1293 = vrcp.f32 %v1058_v37 }
 0x613   : > { %1295 = vtanh.f32 %v1032_v54 }
 0x614   : > { %1297 = vtanh.f32 %v1033_v55 }
 0x61f   : > { %v1294_v28 = vpop.eup %1293 }
 0x620   : > { %v1060_v46 = vmul.f32 %v1294_v28, %v1290_v27  ;;  %v1061_v47 = vmul.f32 %v1294_v28, %v1292_v49  ;;  %v1296_v56 = vpop.eup %1295 }
 0x621   : > { %v1298_v57 = vpop.eup %1297  ;;  %v1036_v58 = vadd.f32 1.0, %v1296_v56 }
 0x622   : > { %v1065_v0 = vrot.slane %v1060_v46, %v1064_v42  ;;  %v1069_v48 = vrot.slane %v1061_v47, %v1064_v42  ;;  %v1037_v59 = vadd.f32 1.0, %v1298_v57 }
 0x623   : > { %v1038_v60 = vmul.f32 0.5, %v1036_v58 }
 0x624   : > { %v1070_v50 = vmul.f32 %v1065_v0, %v1026_v40  ;;  %v1071_v51 = vmul.f32 %v1069_v48, %v1027_v41  ;;  %v1039_v61 = vmul.f32 0.5, %v1037_v59 }
 0x625   : > { %v1085_v62 = vrot.slane %v1038_v60, %v1084_v6 }
 0x626   : > { %v1072_v52 = vadd.f32 %v1071_v51, %v1070_v50  ;;  %v1089_v39 = vrot.slane %v1039_v61, %v1084_v6 }
 0x628   : > { %1073 = vadd.xlane.f32.xlu1 %v1072_v52 }
 0x639   : > { %1018 = vperm.xlu1 %1276, %v1009_v53  }
 0x6b1   : > { %v1074_v43 = vpop.xlane.xlu1 %1073 }
 0x6b2   : > { %v1076_v44 = vadd.f32 %v1075_v26, %v1074_v43 }
 0x6b4   : > { %1079 = vperm.xlu0 %1275, %v1076_v44  }
 0x6b5   : > { %v1019_v7 = vpop.permute.xlu1 %1018 }
 0x6b6   : > { %v1028_v1 = vadd.f32 %v1019_v7, %v1778_v10  ;;  %v1029_v2 = vadd.f32 %v1019_v7, %v1780_v12 }
 0x72f   : > { %v1080_v63 = vpop.permute.xlu0 %1079 }
 0x730   : > { %v1090_v3 = vmul.f32 %v1085_v62, %v1080_v63  ;;  %v1091_v4 = vmul.f32 %v1089_v39, %v1080_v63 }
 0x732   : > { %v1092_v5 = vadd.f32 %v1090_v3, %v1028_v1  ;;  %v1093_v8 = vadd.f32 %v1091_v4, %v1029_v2 }
 0x734   : > { %v1094_v9 = vmul.f32 0.5, %v1092_v5  ;;  %v1095_v11 = vmul.f32 0.5, %v1093_v8 }
 0x736   : > { %1299 = vtanh.f32 %v1094_v9 }
 0x737   : > { %1301 = vtanh.f32 %v1095_v11 }
 0x743   : > { %v1300_v19 = vpop.eup %1299 }
 0x744   : > { %v1302_v13 = vpop.eup %1301  ;;  %v1098_v14 = vadd.f32 1.0, %v1300_v19 }
 0x745   : > { %v1099_v15 = vadd.f32 1.0, %v1302_v13 }
 0x746   : > { %v1100_v16 = vmul.f32 0.5, %v1098_v14 }
 0x747   : > { %v1101_v10 = vmul.f32 0.5, %v1099_v15 }
 0x748   : > { %v1102_v12 = vmul.f32 %v1100_v16, %v1092_v5 }
 0x749   : > { %v1103_v25 = vmul.f32 %v1101_v10, %v1093_v8 }
 0x74a   : > { %1104 = vst [vmem:[%s244_s12] sm:$0xff] %v1102_v12 }
 0x74b   : > { %1105 = vst [vmem:[%s244_s12 + $0x8] sm:$0xff] %v1103_v25 }
 0x74c   : > { %1316 = shalt.err (!%p1313_p3)
}
 0x74d   : > { %s1317_s17 = scalar_lea.hbm %s1803_s9, 256  ;;  %s1321_s20 = scalar_lea.hbm %s1844_s6, 512 }
 0x74e   : > { %p1318_p4 = scmp.ne.s32.totalorder %s1803_s9, %s1317_s17  ;;  %p1322_p9 = scmp.lt.s32.totalorder %s1803_s9, %s1844_s6 }
 0x74f   : > { %p1323_p10 = scmp.lt.s32.totalorder %s1321_s20, %s1317_s17 }
 0x750   : > { %p1319_p7 = pnand %p1318_p4, %p1449_p5 }
 0x751   : > { %p1324_p11 = por %p1323_p10, %p1322_p9 }
 0x752   : > { %p1320_p8 = pneg %p1319_p7 }
 0x754   : > { %p1325_p12 = pnand %p1324_p11, %p1320_p8 }
 0x756   : > { %1328 = shalt.err (!%p1325_p12)
}
 0x757   : > { %1226 = dma.vmem_to_hbm [thread:$0]  (%p1449_p5), %s1122_s13, 256, %s1803_s9, %s1107_s10  }
 0x758 PF: > { %p1232_p13 = scmp.ge.s32.totalorder %s1363_s24, 2  ;;  %s1133_s12 = sand.u32 1, %s1351_s21  }
 0x759   : > { %s1134_s28 = scalar_lea.sflag [#allocation3], %s1133_s12 }
 0x75a   : > { %p1229_p0 = pnand %p1232_p13, %p1453_p6 }
 0x75c   : > { %p1230_p1 = pneg %p1229_p0 }
 0x75e   : > { %1346 = dma.done.wait (%p1230_p1), %s1134_s28, 256  }
 0x75f   : > { %1348 = vsyncadd (%p1230_p1), %s1134_s28, 4294967040  ;;  %p16_p2 = scmp.ge.s32.totalorder %s1436_s27, 4   ;;  %s1847_s21 = smov %s1355_s22 }
 0x760   : > { %s1848_s22 = smov %s1359_s23  ;;  %s1849_s23 = smov %s1447_s30 }
 0x761   : > { %s1850_s24 = smov %s1436_s27  ;;  %18 = sbr.rel (!%p16_p2) target bundleno = 3 (0x3), region = 82 }
 0x766   :  { %1139 = vsyncpa [#allocation3], 1 }
 0x767   :  { %1141 = vsyncpa [#allocation3 + $0x1], 1 }

</bundles_post_ra>
